<compile_context>
chip_gen: v5e
topology: v5e:2x2
jax: 0.10.0
libtpu: 0.0.40
codegen_flags: <defaults>
</compile_context>

<pallas_src>
import jax
import jax.numpy as jnp
from jax.experimental import pallas as pl
from jax.experimental.pallas import tpu as pltpu

EPSILON = 1e-10
INIT_RANGE = 0.5

_LANE = 128            # rules per output tile (lane dim, lane-dense stores)
_GROUP = 8             # batch rows per x slab (static row unroll)
_DSTRIP = 32           # d columns (per half) processed per vreg-resident strip
_TB_MAX = 128          # max batch rows per output tile
_TD_MAX = 512          # max d columns (per half) per reduction grid step
_VMEM_LIMIT = 48 * 1024 * 1024


def _round_up(v, m):
    return ((v + m - 1) // m) * m


# ----------------------------------------------------------------------------
# out[b, j] = Product(1 - (1-x) W^T)[b, j] * A[j]
# grid (B/tb, N/tn, Dh/td); acc is an f32 (tb, tn) VMEM scratch.
# ----------------------------------------------------------------------------
def _conj_kernel(xa_ref, xb_ref, wa_ref, wb_ref, a_ref, o_ref, acc_ref):
    # xa_ref / xb_ref : (tb//8, td, 8)  d on sublanes, 8 batch rows on lanes
    # wa_ref / wb_ref : (td, tn)        d on sublanes, rules on lanes
    # a_ref           : (1, tn)
    # o_ref, acc_ref  : (tb, tn)        batch on sublanes, rules on lanes
    k = pl.program_id(2)
    td, tn = wa_ref.shape
    n_chunks = xa_ref.shape[0]

    @pl.when(k == 0)
    def _init():
        acc_ref[...] = jnp.zeros_like(acc_ref)

    # constant mask used to place each row's (1, tn) total at its sublane
    row_sel = jax.lax.broadcasted_iota(jnp.int32, (_GROUP, tn), 0)

    @pl.loop(0, n_chunks)
    def _chunk(c):
        # One (td, 8) slab per half covers 8 batch rows; (1 - x) computed once
        # per slab (cheap), rows below are statically unrolled.
        ua_slab = 1.0 - xa_ref[c]                      # (td, 8)
        ub_slab = 1.0 - xb_ref[c]
        chunk_tot = jnp.zeros((_GROUP, tn), dtype=jnp.float32)

        for r in range(_GROUP):                        # static unroll
            ua = ua_slab[:, r:r + 1]                   # (td, 1)
            ub = ub_slab[:, r:r + 1]
            part = jnp.zeros((8, tn), dtype=jnp.float32)
            # walk d in 32-wide strips so the elementwise chain stays in vregs
            for s0 in range(0, td, _DSTRIP):
                wa = wa_ref[pl.ds(s0, _DSTRIP), :]     # (32, tn)
                wb = wb_ref[pl.ds(s0, _DSTRIP), :]
                za = 1.0 - ua[s0:s0 + _DSTRIP, :] * wa
                zb = 1.0 - ub[s0:s0 + _DSTRIP, :] * wb
                # pairwise multiply-before-log (2-way; product >= 1e-20 in f32)
                zp = (jnp.maximum(za, 0.0) + EPSILON) * \
                     (jnp.maximum(zb, 0.0) + EPSILON)
                lg = jnp.log(zp)                       # (32, tn)
                for t in range(0, _DSTRIP, 8):         # plain vreg adds
                    part = part + lg[t:t + 8]
            tot = jnp.sum(part, axis=0, keepdims=True)  # (1, tn), lane dense
            chunk_tot = chunk_tot + jnp.where(row_sel == r, tot, 0.0)

        r0 = pl.multiple_of(c * _GROUP, _GROUP)
        acc_ref[pl.ds(r0, _GROUP), :] += chunk_tot

    @pl.when(k == pl.num_programs(2) - 1)
    def _finalize():
        s = acc_ref[...]                               # (tb, tn)
        prod = -pl.reciprocal(s - 1.0, approx=False)   # Product = -1/(-1+s)
        o_ref[...] = (prod * a_ref[...]).astype(o_ref.dtype)


# ----------------------------------------------------------------------------
# Wrapper: padding, half-split for pairwise logs, D-major layouts, tile sizing
# ----------------------------------------------------------------------------
def conjunction_forward(x, W, use_not=False):
    """Pallas implementation of ConjunctionLayer.forward."""
    if use_not:
        x = jnp.concatenate([x, 1.0 - x], axis=1)      # torch.cat((x, 1-x), dim=1)
    B, D = x.shape
    N, Dw = W.shape
    assert D == Dw, f"input_dim mismatch: {D} vs {Dw}"
    # padding invariant: 1.0 + EPSILON must round to 1.0 in f32
    assert EPSILON < 2.0 ** -25
    out_dtype = x.dtype

    xf = x.astype(jnp.float32)
    wf = W.astype(jnp.float32)

    # ---- A = 1 - Product(1 - W): O(N*D), plain XLA (review: drop _a_kernel) --
    s_w = jnp.sum(jnp.log(jnp.maximum(1.0 - wf, 0.0) + EPSILON), axis=1)
    a_vec = 1.0 + 1.0 / (s_w - 1.0)                    # (N,)

    # ---- tile sizing --------------------------------------------------------
    tn = _LANE
    N_pad = _round_up(N, tn)

    B_pad = _round_up(B, _GROUP)
    if B_pad > _TB_MAX:
        n_btiles = -(-B_pad // _TB_MAX)
        tb = _round_up(-(-B_pad // n_btiles), _GROUP)
        B_pad = _round_up(B_pad, tb)
    else:
        tb = B_pad
    # v7x has 2 TensorCores: guarantee >=2 steps on a parallel axis when there
    # is only one 128-wide N tile (near-free on v5e/v6e).
    if N_pad == tn and B_pad >= 2 * _GROUP and tb == B_pad:
        tb = _round_up(B_pad // 2, _GROUP)
        B_pad = _round_up(B_pad, tb)

    # adaptive td: round Dh to 32 (<=512) or 128 (>512), never a 512 multiple
    Dh0 = (D + 1) // 2
    if Dh0 <= _TD_MAX:
        Dh = _round_up(Dh0, _DSTRIP)
        td = Dh
    else:
        Dh = _round_up(Dh0, 128)
        td = next(t for t in (512, 256, 128) if Dh % t == 0)
    D_pad = 2 * Dh
    nk = Dh // td

    # ---- padding & layout prep ----------------------------------------------
    # x D/B padding with 1.0 => (1-x)=0 => z=1 => log contribution exactly 0
    # W D padding with 0.0   => z=1 for padded d
    # W N padding with 0.0   => padded rule columns stay finite (sliced away)
    xp = jnp.pad(xf, ((0, B_pad - B), (0, D_pad - D)), constant_values=1.0)
    wp = jnp.pad(wf, ((0, N_pad - N), (0, D_pad - D)), constant_values=0.0)
    a_row = jnp.pad(a_vec[None, :], ((0, 0), (0, N_pad - N)))

    # halves for the pairwise multiply-before-log (sum over d is order invariant)
    # weights D-major: (Dh, N_pad) -- d on sublanes, rules on lanes
    wa_t = wp[:, :Dh].T
    wb_t = wp[:, Dh:].T
    # x regrouped into (B/8, Dh, 8) slabs -- d on sublanes, 8 rows on lanes
    xa_s = xp[:, :Dh].reshape(B_pad // _GROUP, _GROUP, Dh).transpose(0, 2, 1)
    xb_s = xp[:, Dh:].reshape(B_pad // _GROUP, _GROUP, Dh).transpose(0, 2, 1)

    out_pad = pl.pallas_call(
        _conj_kernel,
        out_shape=jax.ShapeDtypeStruct((B_pad, N_pad), out_dtype),
        grid_spec=pltpu.PrefetchScalarGridSpec(
            num_scalar_prefetch=0,
            grid=(B_pad // tb, N_pad // tn, nk),
            in_specs=[
                pl.BlockSpec((tb // _GROUP, td, _GROUP),
                             lambda bi, ni, k: (bi, k, 0)),   # x half a slabs
                pl.BlockSpec((tb // _GROUP, td, _GROUP),
                             lambda bi, ni, k: (bi, k, 0)),   # x half b slabs
                pl.BlockSpec((td, tn), lambda bi, ni, k: (k, ni)),  # W^T half a
                pl.BlockSpec((td, tn), lambda bi, ni, k: (k, ni)),  # W^T half b
                pl.BlockSpec((1, tn), lambda bi, ni, k: (0, ni)),   # A
            ],
            out_specs=pl.BlockSpec((tb, tn), lambda bi, ni, k: (bi, ni)),
            scratch_shapes=[pltpu.VMEM((tb, tn), jnp.float32)],
        ),
        compiler_params=pltpu.CompilerParams(
            dimension_semantics=("parallel", "parallel", "arbitrary"),
            vmem_limit_bytes=_VMEM_LIMIT),
    )(xa_s, xb_s, wa_t, wb_t, a_row)

    return out_pad[:B, :N]


# ----------------------------------------------------------------------------
# Pure-JAX reference, line-by-line mirror of the PyTorch module
# ----------------------------------------------------------------------------
def conjunction_forward_ref(x, W, use_not=False):
    if use_not:
        x = jnp.concatenate([x, 1.0 - x], axis=1)
    xf = x.astype(jnp.float32)
    wf = W.astype(jnp.float32)

    def product(X):  # reduce over dim=1
        return -1.0 / (-1.0 + jnp.sum(jnp.log(jnp.maximum(X, 0.0) + EPSILON), axis=1))

    A = 1.0 - product(1.0 - wf)                                     # (n,)
    Z = 1.0 - (1.0 - xf)[:, :, None] * wf.T[None, :, :]             # (B, D, n)
    return (product(Z) * A).astype(x.dtype)                         # (B, n)


if __name__ == "__main__":
    key = jax.random.PRNGKey(0)

    def run_case(batch, n, input_dim, use_not, case_key):
        kx, kw = jax.random.split(case_key)
        d_w = input_dim * 2 if use_not else input_dim
        x = jax.random.uniform(kx, (batch, input_dim), dtype=jnp.float32)
        W = INIT_RANGE * jax.random.uniform(kw, (n, d_w), dtype=jnp.float32)
        out = jax.block_until_ready(conjunction_forward(x, W, use_not=use_not))
        ref = conjunction_forward_ref(x, W, use_not=use_not)
        assert out.shape == (batch, n), out.shape
        max_err = float(jnp.max(jnp.abs(out - ref)))
        assert jnp.allclose(out, ref, atol=1e-5, rtol=1e-5), max_err

    # Module-sized demo (n=8, input_dim=16, batch=2).
    run_case(batch=2, n=8, input_dim=16, use_not=False,
             case_key=jax.random.fold_in(key, 0))
    # Padding + N tiling + use_not path.
    run_case(batch=64, n=200, input_dim=100, use_not=True,
             case_key=jax.random.fold_in(key, 1))
    # D-reduction grid axis (nk > 1), adaptive td, and the batch-split path.
    run_case(batch=16, n=24, input_dim=1500, use_not=False,
             case_key=jax.random.fold_in(key, 2))

    print("KERNEL_OK")
</pallas_src>

<mosaic_0001>
module attributes {stable_mosaic.version = 11 : i64} {
  func.func @_conj_kernel(%arg0: i32, %arg1: i32, %arg2: i32, %arg3: memref<1x32x8xf32, #tpu.memory_space<vmem>>, %arg4: memref<1x32x8xf32, #tpu.memory_space<vmem>>, %arg5: memref<32x128xf32, #tpu.memory_space<vmem>>, %arg6: memref<32x128xf32, #tpu.memory_space<vmem>>, %arg7: memref<1x128xf32, #tpu.memory_space<vmem>>, %arg8: memref<8x128xf32, #tpu.memory_space<vmem>>, %arg9: memref<8x128xf32, #tpu.memory_space<vmem>>) attributes {dimension_semantics = [#tpu.dimension_semantics<parallel>, #tpu.dimension_semantics<parallel>, #tpu.dimension_semantics<arbitrary>], iteration_bounds = array<i64: 1, 1, 1>, scalar_prefetch = 0 : i64, scratch_operands = 1 : i64, tpu.core_type = #tpu.core_type<tc>, window_params = [{transform_indices = @transform_0, window_bounds = array<i64: 1, 32, 8>}, {transform_indices = @transform_1, window_bounds = array<i64: 1, 32, 8>}, {transform_indices = @transform_2, window_bounds = array<i64: 32, 128>}, {transform_indices = @transform_3, window_bounds = array<i64: 32, 128>}, {transform_indices = @transform_4, window_bounds = array<i64: 1, 128>}, {transform_indices = @transform_5, window_bounds = array<i64: 8, 128>}]} {
    %c0_i32 = arith.constant 0 : i32
    %0 = arith.cmpi eq, %arg2, %c0_i32 : i32
    %1 = arith.extui %0 : i1 to i32
    %c0_i32_0 = arith.constant 0 : i32
    %2 = arith.cmpi ne, %1, %c0_i32_0 : i32
    scf.if %2 {
      %cst_119 = arith.constant 0.000000e+00 : f32
      %347 = vector.broadcast %cst_119 : f32 to vector<8x128xf32>
      %c0_120 = arith.constant 0 : index
      %c0_121 = arith.constant 0 : index
      %348 = vector.load %arg9[%c0_120, %c0_121] : memref<8x128xf32, #tpu.memory_space<vmem>>, vector<8x128xf32>
      tpu.vector_store %arg9[%c0_120, %c0_121], %347 {strides = array<i32>} : memref<8x128xf32, #tpu.memory_space<vmem>>, vector<8x128xf32>,
    } else {
    }
    %3 = tpu.iota {dimensions = array<i32: 0>} : vector<8x128xi32>
    %c0_i32_1 = arith.constant 0 : i32
    %c1_i32 = arith.constant 1 : i32
    %4 = arith.muli %c0_i32_1, %c1_i32 : i32
    %c0_i32_2 = arith.constant 0 : i32
    %5 = arith.addi %c0_i32_2, %4 : i32
    %6 = arith.index_cast %5 : i32 to index
    %c0 = arith.constant 0 : index
    %c0_3 = arith.constant 0 : index
    %7 = vector.load %arg3[%6, %c0, %c0_3] : memref<1x32x8xf32, #tpu.memory_space<vmem>>, vector<1x32x8xf32>
    %8 = vector.shape_cast %7 : vector<1x32x8xf32> to vector<32x8xf32>
    %cst = arith.constant 1.000000e+00 : f32
    %9 = vector.broadcast %cst : f32 to vector<32x8xf32>
    %10 = arith.subf %9, %8 : vector<32x8xf32>
    %11 = arith.index_cast %5 : i32 to index
    %c0_4 = arith.constant 0 : index
    %c0_5 = arith.constant 0 : index
    %12 = vector.load %arg4[%11, %c0_4, %c0_5] : memref<1x32x8xf32, #tpu.memory_space<vmem>>, vector<1x32x8xf32>
    %13 = vector.shape_cast %12 : vector<1x32x8xf32> to vector<32x8xf32>
    %cst_6 = arith.constant 1.000000e+00 : f32
    %14 = vector.broadcast %cst_6 : f32 to vector<32x8xf32>
    %15 = arith.subf %14, %13 : vector<32x8xf32>
    %cst_7 = arith.constant 0.000000e+00 : f32
    %16 = vector.broadcast %cst_7 : f32 to vector<8x128xf32>
    %17 = vector.extract_strided_slice %10 {offsets = [0, 0], sizes = [32, 1], strides = [1, 1]} : vector<32x8xf32> to vector<32x1xf32>
    %18 = vector.extract_strided_slice %15 {offsets = [0, 0], sizes = [32, 1], strides = [1, 1]} : vector<32x8xf32> to vector<32x1xf32>
    %cst_8 = arith.constant 0.000000e+00 : f32
    %19 = vector.broadcast %cst_8 : f32 to vector<8x128xf32>
    %c0_9 = arith.constant 0 : index
    %c0_10 = arith.constant 0 : index
    %20 = vector.load %arg5[%c0_9, %c0_10] : memref<32x128xf32, #tpu.memory_space<vmem>>, vector<32x128xf32>
    %c0_11 = arith.constant 0 : index
    %c0_12 = arith.constant 0 : index
    %21 = vector.load %arg6[%c0_11, %c0_12] : memref<32x128xf32, #tpu.memory_space<vmem>>, vector<32x128xf32>
    %22 = vector.broadcast %17 : vector<32x1xf32> to vector<32x128xf32>
    %23 = arith.mulf %22, %20 : vector<32x128xf32>
    %cst_13 = arith.constant 1.000000e+00 : f32
    %24 = vector.broadcast %cst_13 : f32 to vector<32x128xf32>
    %25 = arith.subf %24, %23 : vector<32x128xf32>
    %26 = vector.broadcast %18 : vector<32x1xf32> to vector<32x128xf32>
    %27 = arith.mulf %26, %21 : vector<32x128xf32>
    %cst_14 = arith.constant 1.000000e+00 : f32
    %28 = vector.broadcast %cst_14 : f32 to vector<32x128xf32>
    %29 = arith.subf %28, %27 : vector<32x128xf32>
    %cst_15 = arith.constant 0.000000e+00 : f32
    %30 = vector.broadcast %cst_15 : f32 to vector<32x128xf32>
    %31 = arith.maximumf %25, %30 : vector<32x128xf32>
    %cst_16 = arith.constant 1.000000e-10 : f32
    %32 = vector.broadcast %cst_16 : f32 to vector<32x128xf32>
    %33 = arith.addf %31, %32 : vector<32x128xf32>
    %cst_17 = arith.constant 0.000000e+00 : f32
    %34 = vector.broadcast %cst_17 : f32 to vector<32x128xf32>
    %35 = arith.maximumf %29, %34 : vector<32x128xf32>
    %cst_18 = arith.constant 1.000000e-10 : f32
    %36 = vector.broadcast %cst_18 : f32 to vector<32x128xf32>
    %37 = arith.addf %35, %36 : vector<32x128xf32>
    %38 = arith.mulf %33, %37 : vector<32x128xf32>
    %39 = math.log %38 : vector<32x128xf32>
    %40 = vector.extract_strided_slice %39 {offsets = [0, 0], sizes = [8, 128], strides = [1, 1]} : vector<32x128xf32> to vector<8x128xf32>
    %41 = arith.addf %19, %40 : vector<8x128xf32>
    %42 = vector.extract_strided_slice %39 {offsets = [8, 0], sizes = [8, 128], strides = [1, 1]} : vector<32x128xf32> to vector<8x128xf32>
    %43 = arith.addf %41, %42 : vector<8x128xf32>
    %44 = vector.extract_strided_slice %39 {offsets = [16, 0], sizes = [8, 128], strides = [1, 1]} : vector<32x128xf32> to vector<8x128xf32>
    %45 = arith.addf %43, %44 : vector<8x128xf32>
    %46 = vector.extract_strided_slice %39 {offsets = [24, 0], sizes = [8, 128], strides = [1, 1]} : vector<32x128xf32> to vector<8x128xf32>
    %47 = arith.addf %45, %46 : vector<8x128xf32>
    %cst_19 = arith.constant dense<0.000000e+00> : vector<128xf32>
    %48 = vector.multi_reduction <add>, %47, %cst_19 [0] : vector<8x128xf32> to vector<128xf32>
    %49 = vector.shape_cast %48 : vector<128xf32> to vector<1x128xf32>
    %c0_i32_20 = arith.constant 0 : i32
    %50 = vector.broadcast %c0_i32_20 : i32 to vector<8x128xi32>
    %51 = arith.cmpi eq, %3, %50 : vector<8x128xi32>
    %cst_21 = arith.constant 0.000000e+00 : f32
    %52 = vector.shape_cast %49 : vector<1x128xf32> to vector<1x128xf32>
    %53 = vector.broadcast %52 : vector<1x128xf32> to vector<8x128xf32>
    %54 = vector.broadcast %cst_21 : f32 to vector<8x128xf32>
    %55 = arith.select %51, %53, %54 : vector<8x128xi1>, vector<8x128xf32>
    %56 = arith.addf %16, %55 : vector<8x128xf32>
    %57 = vector.extract_strided_slice %10 {offsets = [0, 1], sizes = [32, 1], strides = [1, 1]} : vector<32x8xf32> to vector<32x1xf32>
    %58 = vector.extract_strided_slice %15 {offsets = [0, 1], sizes = [32, 1], strides = [1, 1]} : vector<32x8xf32> to vector<32x1xf32>
    %cst_22 = arith.constant 0.000000e+00 : f32
    %59 = vector.broadcast %cst_22 : f32 to vector<8x128xf32>
    %c0_23 = arith.constant 0 : index
    %c0_24 = arith.constant 0 : index
    %60 = vector.load %arg5[%c0_23, %c0_24] : memref<32x128xf32, #tpu.memory_space<vmem>>, vector<32x128xf32>
    %c0_25 = arith.constant 0 : index
    %c0_26 = arith.constant 0 : index
    %61 = vector.load %arg6[%c0_25, %c0_26] : memref<32x128xf32, #tpu.memory_space<vmem>>, vector<32x128xf32>
    %62 = vector.broadcast %57 : vector<32x1xf32> to vector<32x128xf32>
    %63 = arith.mulf %62, %60 : vector<32x128xf32>
    %cst_27 = arith.constant 1.000000e+00 : f32
    %64 = vector.broadcast %cst_27 : f32 to vector<32x128xf32>
    %65 = arith.subf %64, %63 : vector<32x128xf32>
    %66 = vector.broadcast %58 : vector<32x1xf32> to vector<32x128xf32>
    %67 = arith.mulf %66, %61 : vector<32x128xf32>
    %cst_28 = arith.constant 1.000000e+00 : f32
    %68 = vector.broadcast %cst_28 : f32 to vector<32x128xf32>
    %69 = arith.subf %68, %67 : vector<32x128xf32>
    %cst_29 = arith.constant 0.000000e+00 : f32
    %70 = vector.broadcast %cst_29 : f32 to vector<32x128xf32>
    %71 = arith.maximumf %65, %70 : vector<32x128xf32>
    %cst_30 = arith.constant 1.000000e-10 : f32
    %72 = vector.broadcast %cst_30 : f32 to vector<32x128xf32>
    %73 = arith.addf %71, %72 : vector<32x128xf32>
    %cst_31 = arith.constant 0.000000e+00 : f32
    %74 = vector.broadcast %cst_31 : f32 to vector<32x128xf32>
    %75 = arith.maximumf %69, %74 : vector<32x128xf32>
    %cst_32 = arith.constant 1.000000e-10 : f32
    %76 = vector.broadcast %cst_32 : f32 to vector<32x128xf32>
    %77 = arith.addf %75, %76 : vector<32x128xf32>
    %78 = arith.mulf %73, %77 : vector<32x128xf32>
    %79 = math.log %78 : vector<32x128xf32>
    %80 = vector.extract_strided_slice %79 {offsets = [0, 0], sizes = [8, 128], strides = [1, 1]} : vector<32x128xf32> to vector<8x128xf32>
    %81 = arith.addf %59, %80 : vector<8x128xf32>
    %82 = vector.extract_strided_slice %79 {offsets = [8, 0], sizes = [8, 128], strides = [1, 1]} : vector<32x128xf32> to vector<8x128xf32>
    %83 = arith.addf %81, %82 : vector<8x128xf32>
    %84 = vector.extract_strided_slice %79 {offsets = [16, 0], sizes = [8, 128], strides = [1, 1]} : vector<32x128xf32> to vector<8x128xf32>
    %85 = arith.addf %83, %84 : vector<8x128xf32>
    %86 = vector.extract_strided_slice %79 {offsets = [24, 0], sizes = [8, 128], strides = [1, 1]} : vector<32x128xf32> to vector<8x128xf32>
    %87 = arith.addf %85, %86 : vector<8x128xf32>
    %cst_33 = arith.constant dense<0.000000e+00> : vector<128xf32>
    %88 = vector.multi_reduction <add>, %87, %cst_33 [0] : vector<8x128xf32> to vector<128xf32>
    %89 = vector.shape_cast %88 : vector<128xf32> to vector<1x128xf32>
    %c1_i32_34 = arith.constant 1 : i32
    %90 = vector.broadcast %c1_i32_34 : i32 to vector<8x128xi32>
    %91 = arith.cmpi eq, %3, %90 : vector<8x128xi32>
    %cst_35 = arith.constant 0.000000e+00 : f32
    %92 = vector.shape_cast %89 : vector<1x128xf32> to vector<1x128xf32>
    %93 = vector.broadcast %92 : vector<1x128xf32> to vector<8x128xf32>
    %94 = vector.broadcast %cst_35 : f32 to vector<8x128xf32>
    %95 = arith.select %91, %93, %94 : vector<8x128xi1>, vector<8x128xf32>
    %96 = arith.addf %56, %95 : vector<8x128xf32>
    %97 = vector.extract_strided_slice %10 {offsets = [0, 2], sizes = [32, 1], strides = [1, 1]} : vector<32x8xf32> to vector<32x1xf32>
    %98 = vector.extract_strided_slice %15 {offsets = [0, 2], sizes = [32, 1], strides = [1, 1]} : vector<32x8xf32> to vector<32x1xf32>
    %cst_36 = arith.constant 0.000000e+00 : f32
    %99 = vector.broadcast %cst_36 : f32 to vector<8x128xf32>
    %c0_37 = arith.constant 0 : index
    %c0_38 = arith.constant 0 : index
    %100 = vector.load %arg5[%c0_37, %c0_38] : memref<32x128xf32, #tpu.memory_space<vmem>>, vector<32x128xf32>
    %c0_39 = arith.constant 0 : index
    %c0_40 = arith.constant 0 : index
    %101 = vector.load %arg6[%c0_39, %c0_40] : memref<32x128xf32, #tpu.memory_space<vmem>>, vector<32x128xf32>
    %102 = vector.broadcast %97 : vector<32x1xf32> to vector<32x128xf32>
    %103 = arith.mulf %102, %100 : vector<32x128xf32>
    %cst_41 = arith.constant 1.000000e+00 : f32
    %104 = vector.broadcast %cst_41 : f32 to vector<32x128xf32>
    %105 = arith.subf %104, %103 : vector<32x128xf32>
    %106 = vector.broadcast %98 : vector<32x1xf32> to vector<32x128xf32>
    %107 = arith.mulf %106, %101 : vector<32x128xf32>
    %cst_42 = arith.constant 1.000000e+00 : f32
    %108 = vector.broadcast %cst_42 : f32 to vector<32x128xf32>
    %109 = arith.subf %108, %107 : vector<32x128xf32>
    %cst_43 = arith.constant 0.000000e+00 : f32
    %110 = vector.broadcast %cst_43 : f32 to vector<32x128xf32>
    %111 = arith.maximumf %105, %110 : vector<32x128xf32>
    %cst_44 = arith.constant 1.000000e-10 : f32
    %112 = vector.broadcast %cst_44 : f32 to vector<32x128xf32>
    %113 = arith.addf %111, %112 : vector<32x128xf32>
    %cst_45 = arith.constant 0.000000e+00 : f32
    %114 = vector.broadcast %cst_45 : f32 to vector<32x128xf32>
    %115 = arith.maximumf %109, %114 : vector<32x128xf32>
    %cst_46 = arith.constant 1.000000e-10 : f32
    %116 = vector.broadcast %cst_46 : f32 to vector<32x128xf32>
    %117 = arith.addf %115, %116 : vector<32x128xf32>
    %118 = arith.mulf %113, %117 : vector<32x128xf32>
    %119 = math.log %118 : vector<32x128xf32>
    %120 = vector.extract_strided_slice %119 {offsets = [0, 0], sizes = [8, 128], strides = [1, 1]} : vector<32x128xf32> to vector<8x128xf32>
    %121 = arith.addf %99, %120 : vector<8x128xf32>
    %122 = vector.extract_strided_slice %119 {offsets = [8, 0], sizes = [8, 128], strides = [1, 1]} : vector<32x128xf32> to vector<8x128xf32>
    %123 = arith.addf %121, %122 : vector<8x128xf32>
    %124 = vector.extract_strided_slice %119 {offsets = [16, 0], sizes = [8, 128], strides = [1, 1]} : vector<32x128xf32> to vector<8x128xf32>
    %125 = arith.addf %123, %124 : vector<8x128xf32>
    %126 = vector.extract_strided_slice %119 {offsets = [24, 0], sizes = [8, 128], strides = [1, 1]} : vector<32x128xf32> to vector<8x128xf32>
    %127 = arith.addf %125, %126 : vector<8x128xf32>
    %cst_47 = arith.constant dense<0.000000e+00> : vector<128xf32>
    %128 = vector.multi_reduction <add>, %127, %cst_47 [0] : vector<8x128xf32> to vector<128xf32>
    %129 = vector.shape_cast %128 : vector<128xf32> to vector<1x128xf32>
    %c2_i32 = arith.constant 2 : i32
    %130 = vector.broadcast %c2_i32 : i32 to vector<8x128xi32>
    %131 = arith.cmpi eq, %3, %130 : vector<8x128xi32>
    %cst_48 = arith.constant 0.000000e+00 : f32
    %132 = vector.shape_cast %129 : vector<1x128xf32> to vector<1x128xf32>
    %133 = vector.broadcast %132 : vector<1x128xf32> to vector<8x128xf32>
    %134 = vector.broadcast %cst_48 : f32 to vector<8x128xf32>
    %135 = arith.select %131, %133, %134 : vector<8x128xi1>, vector<8x128xf32>
    %136 = arith.addf %96, %135 : vector<8x128xf32>
    %137 = vector.extract_strided_slice %10 {offsets = [0, 3], sizes = [32, 1], strides = [1, 1]} : vector<32x8xf32> to vector<32x1xf32>
    %138 = vector.extract_strided_slice %15 {offsets = [0, 3], sizes = [32, 1], strides = [1, 1]} : vector<32x8xf32> to vector<32x1xf32>
    %cst_49 = arith.constant 0.000000e+00 : f32
    %139 = vector.broadcast %cst_49 : f32 to vector<8x128xf32>
    %c0_50 = arith.constant 0 : index
    %c0_51 = arith.constant 0 : index
    %140 = vector.load %arg5[%c0_50, %c0_51] : memref<32x128xf32, #tpu.memory_space<vmem>>, vector<32x128xf32>
    %c0_52 = arith.constant 0 : index
    %c0_53 = arith.constant 0 : index
    %141 = vector.load %arg6[%c0_52, %c0_53] : memref<32x128xf32, #tpu.memory_space<vmem>>, vector<32x128xf32>
    %142 = vector.broadcast %137 : vector<32x1xf32> to vector<32x128xf32>
    %143 = arith.mulf %142, %140 : vector<32x128xf32>
    %cst_54 = arith.constant 1.000000e+00 : f32
    %144 = vector.broadcast %cst_54 : f32 to vector<32x128xf32>
    %145 = arith.subf %144, %143 : vector<32x128xf32>
    %146 = vector.broadcast %138 : vector<32x1xf32> to vector<32x128xf32>
    %147 = arith.mulf %146, %141 : vector<32x128xf32>
    %cst_55 = arith.constant 1.000000e+00 : f32
    %148 = vector.broadcast %cst_55 : f32 to vector<32x128xf32>
    %149 = arith.subf %148, %147 : vector<32x128xf32>
    %cst_56 = arith.constant 0.000000e+00 : f32
    %150 = vector.broadcast %cst_56 : f32 to vector<32x128xf32>
    %151 = arith.maximumf %145, %150 : vector<32x128xf32>
    %cst_57 = arith.constant 1.000000e-10 : f32
    %152 = vector.broadcast %cst_57 : f32 to vector<32x128xf32>
    %153 = arith.addf %151, %152 : vector<32x128xf32>
    %cst_58 = arith.constant 0.000000e+00 : f32
    %154 = vector.broadcast %cst_58 : f32 to vector<32x128xf32>
    %155 = arith.maximumf %149, %154 : vector<32x128xf32>
    %cst_59 = arith.constant 1.000000e-10 : f32
    %156 = vector.broadcast %cst_59 : f32 to vector<32x128xf32>
    %157 = arith.addf %155, %156 : vector<32x128xf32>
    %158 = arith.mulf %153, %157 : vector<32x128xf32>
    %159 = math.log %158 : vector<32x128xf32>
    %160 = vector.extract_strided_slice %159 {offsets = [0, 0], sizes = [8, 128], strides = [1, 1]} : vector<32x128xf32> to vector<8x128xf32>
    %161 = arith.addf %139, %160 : vector<8x128xf32>
    %162 = vector.extract_strided_slice %159 {offsets = [8, 0], sizes = [8, 128], strides = [1, 1]} : vector<32x128xf32> to vector<8x128xf32>
    %163 = arith.addf %161, %162 : vector<8x128xf32>
    %164 = vector.extract_strided_slice %159 {offsets = [16, 0], sizes = [8, 128], strides = [1, 1]} : vector<32x128xf32> to vector<8x128xf32>
    %165 = arith.addf %163, %164 : vector<8x128xf32>
    %166 = vector.extract_strided_slice %159 {offsets = [24, 0], sizes = [8, 128], strides = [1, 1]} : vector<32x128xf32> to vector<8x128xf32>
    %167 = arith.addf %165, %166 : vector<8x128xf32>
    %cst_60 = arith.constant dense<0.000000e+00> : vector<128xf32>
    %168 = vector.multi_reduction <add>, %167, %cst_60 [0] : vector<8x128xf32> to vector<128xf32>
    %169 = vector.shape_cast %168 : vector<128xf32> to vector<1x128xf32>
    %c3_i32 = arith.constant 3 : i32
    %170 = vector.broadcast %c3_i32 : i32 to vector<8x128xi32>
    %171 = arith.cmpi eq, %3, %170 : vector<8x128xi32>
    %cst_61 = arith.constant 0.000000e+00 : f32
    %172 = vector.shape_cast %169 : vector<1x128xf32> to vector<1x128xf32>
    %173 = vector.broadcast %172 : vector<1x128xf32> to vector<8x128xf32>
    %174 = vector.broadcast %cst_61 : f32 to vector<8x128xf32>
    %175 = arith.select %171, %173, %174 : vector<8x128xi1>, vector<8x128xf32>
    %176 = arith.addf %136, %175 : vector<8x128xf32>
    %177 = vector.extract_strided_slice %10 {offsets = [0, 4], sizes = [32, 1], strides = [1, 1]} : vector<32x8xf32> to vector<32x1xf32>
    %178 = vector.extract_strided_slice %15 {offsets = [0, 4], sizes = [32, 1], strides = [1, 1]} : vector<32x8xf32> to vector<32x1xf32>
    %cst_62 = arith.constant 0.000000e+00 : f32
    %179 = vector.broadcast %cst_62 : f32 to vector<8x128xf32>
    %c0_63 = arith.constant 0 : index
    %c0_64 = arith.constant 0 : index
    %180 = vector.load %arg5[%c0_63, %c0_64] : memref<32x128xf32, #tpu.memory_space<vmem>>, vector<32x128xf32>
    %c0_65 = arith.constant 0 : index
    %c0_66 = arith.constant 0 : index
    %181 = vector.load %arg6[%c0_65, %c0_66] : memref<32x128xf32, #tpu.memory_space<vmem>>, vector<32x128xf32>
    %182 = vector.broadcast %177 : vector<32x1xf32> to vector<32x128xf32>
    %183 = arith.mulf %182, %180 : vector<32x128xf32>
    %cst_67 = arith.constant 1.000000e+00 : f32
    %184 = vector.broadcast %cst_67 : f32 to vector<32x128xf32>
    %185 = arith.subf %184, %183 : vector<32x128xf32>
    %186 = vector.broadcast %178 : vector<32x1xf32> to vector<32x128xf32>
    %187 = arith.mulf %186, %181 : vector<32x128xf32>
    %cst_68 = arith.constant 1.000000e+00 : f32
    %188 = vector.broadcast %cst_68 : f32 to vector<32x128xf32>
    %189 = arith.subf %188, %187 : vector<32x128xf32>
    %cst_69 = arith.constant 0.000000e+00 : f32
    %190 = vector.broadcast %cst_69 : f32 to vector<32x128xf32>
    %191 = arith.maximumf %185, %190 : vector<32x128xf32>
    %cst_70 = arith.constant 1.000000e-10 : f32
    %192 = vector.broadcast %cst_70 : f32 to vector<32x128xf32>
    %193 = arith.addf %191, %192 : vector<32x128xf32>
    %cst_71 = arith.constant 0.000000e+00 : f32
    %194 = vector.broadcast %cst_71 : f32 to vector<32x128xf32>
    %195 = arith.maximumf %189, %194 : vector<32x128xf32>
    %cst_72 = arith.constant 1.000000e-10 : f32
    %196 = vector.broadcast %cst_72 : f32 to vector<32x128xf32>
    %197 = arith.addf %195, %196 : vector<32x128xf32>
    %198 = arith.mulf %193, %197 : vector<32x128xf32>
    %199 = math.log %198 : vector<32x128xf32>
    %200 = vector.extract_strided_slice %199 {offsets = [0, 0], sizes = [8, 128], strides = [1, 1]} : vector<32x128xf32> to vector<8x128xf32>
    %201 = arith.addf %179, %200 : vector<8x128xf32>
    %202 = vector.extract_strided_slice %199 {offsets = [8, 0], sizes = [8, 128], strides = [1, 1]} : vector<32x128xf32> to vector<8x128xf32>
    %203 = arith.addf %201, %202 : vector<8x128xf32>
    %204 = vector.extract_strided_slice %199 {offsets = [16, 0], sizes = [8, 128], strides = [1, 1]} : vector<32x128xf32> to vector<8x128xf32>
    %205 = arith.addf %203, %204 : vector<8x128xf32>
    %206 = vector.extract_strided_slice %199 {offsets = [24, 0], sizes = [8, 128], strides = [1, 1]} : vector<32x128xf32> to vector<8x128xf32>
    %207 = arith.addf %205, %206 : vector<8x128xf32>
    %cst_73 = arith.constant dense<0.000000e+00> : vector<128xf32>
    %208 = vector.multi_reduction <add>, %207, %cst_73 [0] : vector<8x128xf32> to vector<128xf32>
    %209 = vector.shape_cast %208 : vector<128xf32> to vector<1x128xf32>
    %c4_i32 = arith.constant 4 : i32
    %210 = vector.broadcast %c4_i32 : i32 to vector<8x128xi32>
    %211 = arith.cmpi eq, %3, %210 : vector<8x128xi32>
    %cst_74 = arith.constant 0.000000e+00 : f32
    %212 = vector.shape_cast %209 : vector<1x128xf32> to vector<1x128xf32>
    %213 = vector.broadcast %212 : vector<1x128xf32> to vector<8x128xf32>
    %214 = vector.broadcast %cst_74 : f32 to vector<8x128xf32>
    %215 = arith.select %211, %213, %214 : vector<8x128xi1>, vector<8x128xf32>
    %216 = arith.addf %176, %215 : vector<8x128xf32>
    %217 = vector.extract_strided_slice %10 {offsets = [0, 5], sizes = [32, 1], strides = [1, 1]} : vector<32x8xf32> to vector<32x1xf32>
    %218 = vector.extract_strided_slice %15 {offsets = [0, 5], sizes = [32, 1], strides = [1, 1]} : vector<32x8xf32> to vector<32x1xf32>
    %cst_75 = arith.constant 0.000000e+00 : f32
    %219 = vector.broadcast %cst_75 : f32 to vector<8x128xf32>
    %c0_76 = arith.constant 0 : index
    %c0_77 = arith.constant 0 : index
    %220 = vector.load %arg5[%c0_76, %c0_77] : memref<32x128xf32, #tpu.memory_space<vmem>>, vector<32x128xf32>
    %c0_78 = arith.constant 0 : index
    %c0_79 = arith.constant 0 : index
    %221 = vector.load %arg6[%c0_78, %c0_79] : memref<32x128xf32, #tpu.memory_space<vmem>>, vector<32x128xf32>
    %222 = vector.broadcast %217 : vector<32x1xf32> to vector<32x128xf32>
    %223 = arith.mulf %222, %220 : vector<32x128xf32>
    %cst_80 = arith.constant 1.000000e+00 : f32
    %224 = vector.broadcast %cst_80 : f32 to vector<32x128xf32>
    %225 = arith.subf %224, %223 : vector<32x128xf32>
    %226 = vector.broadcast %218 : vector<32x1xf32> to vector<32x128xf32>
    %227 = arith.mulf %226, %221 : vector<32x128xf32>
    %cst_81 = arith.constant 1.000000e+00 : f32
    %228 = vector.broadcast %cst_81 : f32 to vector<32x128xf32>
    %229 = arith.subf %228, %227 : vector<32x128xf32>
    %cst_82 = arith.constant 0.000000e+00 : f32
    %230 = vector.broadcast %cst_82 : f32 to vector<32x128xf32>
    %231 = arith.maximumf %225, %230 : vector<32x128xf32>
    %cst_83 = arith.constant 1.000000e-10 : f32
    %232 = vector.broadcast %cst_83 : f32 to vector<32x128xf32>
    %233 = arith.addf %231, %232 : vector<32x128xf32>
    %cst_84 = arith.constant 0.000000e+00 : f32
    %234 = vector.broadcast %cst_84 : f32 to vector<32x128xf32>
    %235 = arith.maximumf %229, %234 : vector<32x128xf32>
    %cst_85 = arith.constant 1.000000e-10 : f32
    %236 = vector.broadcast %cst_85 : f32 to vector<32x128xf32>
    %237 = arith.addf %235, %236 : vector<32x128xf32>
    %238 = arith.mulf %233, %237 : vector<32x128xf32>
    %239 = math.log %238 : vector<32x128xf32>
    %240 = vector.extract_strided_slice %239 {offsets = [0, 0], sizes = [8, 128], strides = [1, 1]} : vector<32x128xf32> to vector<8x128xf32>
    %241 = arith.addf %219, %240 : vector<8x128xf32>
    %242 = vector.extract_strided_slice %239 {offsets = [8, 0], sizes = [8, 128], strides = [1, 1]} : vector<32x128xf32> to vector<8x128xf32>
    %243 = arith.addf %241, %242 : vector<8x128xf32>
    %244 = vector.extract_strided_slice %239 {offsets = [16, 0], sizes = [8, 128], strides = [1, 1]} : vector<32x128xf32> to vector<8x128xf32>
    %245 = arith.addf %243, %244 : vector<8x128xf32>
    %246 = vector.extract_strided_slice %239 {offsets = [24, 0], sizes = [8, 128], strides = [1, 1]} : vector<32x128xf32> to vector<8x128xf32>
    %247 = arith.addf %245, %246 : vector<8x128xf32>
    %cst_86 = arith.constant dense<0.000000e+00> : vector<128xf32>
    %248 = vector.multi_reduction <add>, %247, %cst_86 [0] : vector<8x128xf32> to vector<128xf32>
    %249 = vector.shape_cast %248 : vector<128xf32> to vector<1x128xf32>
    %c5_i32 = arith.constant 5 : i32
    %250 = vector.broadcast %c5_i32 : i32 to vector<8x128xi32>
    %251 = arith.cmpi eq, %3, %250 : vector<8x128xi32>
    %cst_87 = arith.constant 0.000000e+00 : f32
    %252 = vector.shape_cast %249 : vector<1x128xf32> to vector<1x128xf32>
    %253 = vector.broadcast %252 : vector<1x128xf32> to vector<8x128xf32>
    %254 = vector.broadcast %cst_87 : f32 to vector<8x128xf32>
    %255 = arith.select %251, %253, %254 : vector<8x128xi1>, vector<8x128xf32>
    %256 = arith.addf %216, %255 : vector<8x128xf32>
    %257 = vector.extract_strided_slice %10 {offsets = [0, 6], sizes = [32, 1], strides = [1, 1]} : vector<32x8xf32> to vector<32x1xf32>
    %258 = vector.extract_strided_slice %15 {offsets = [0, 6], sizes = [32, 1], strides = [1, 1]} : vector<32x8xf32> to vector<32x1xf32>
    %cst_88 = arith.constant 0.000000e+00 : f32
    %259 = vector.broadcast %cst_88 : f32 to vector<8x128xf32>
    %c0_89 = arith.constant 0 : index
    %c0_90 = arith.constant 0 : index
    %260 = vector.load %arg5[%c0_89, %c0_90] : memref<32x128xf32, #tpu.memory_space<vmem>>, vector<32x128xf32>
    %c0_91 = arith.constant 0 : index
    %c0_92 = arith.constant 0 : index
    %261 = vector.load %arg6[%c0_91, %c0_92] : memref<32x128xf32, #tpu.memory_space<vmem>>, vector<32x128xf32>
    %262 = vector.broadcast %257 : vector<32x1xf32> to vector<32x128xf32>
    %263 = arith.mulf %262, %260 : vector<32x128xf32>
    %cst_93 = arith.constant 1.000000e+00 : f32
    %264 = vector.broadcast %cst_93 : f32 to vector<32x128xf32>
    %265 = arith.subf %264, %263 : vector<32x128xf32>
    %266 = vector.broadcast %258 : vector<32x1xf32> to vector<32x128xf32>
    %267 = arith.mulf %266, %261 : vector<32x128xf32>
    %cst_94 = arith.constant 1.000000e+00 : f32
    %268 = vector.broadcast %cst_94 : f32 to vector<32x128xf32>
    %269 = arith.subf %268, %267 : vector<32x128xf32>
    %cst_95 = arith.constant 0.000000e+00 : f32
    %270 = vector.broadcast %cst_95 : f32 to vector<32x128xf32>
    %271 = arith.maximumf %265, %270 : vector<32x128xf32>
    %cst_96 = arith.constant 1.000000e-10 : f32
    %272 = vector.broadcast %cst_96 : f32 to vector<32x128xf32>
    %273 = arith.addf %271, %272 : vector<32x128xf32>
    %cst_97 = arith.constant 0.000000e+00 : f32
    %274 = vector.broadcast %cst_97 : f32 to vector<32x128xf32>
    %275 = arith.maximumf %269, %274 : vector<32x128xf32>
    %cst_98 = arith.constant 1.000000e-10 : f32
    %276 = vector.broadcast %cst_98 : f32 to vector<32x128xf32>
    %277 = arith.addf %275, %276 : vector<32x128xf32>
    %278 = arith.mulf %273, %277 : vector<32x128xf32>
    %279 = math.log %278 : vector<32x128xf32>
    %280 = vector.extract_strided_slice %279 {offsets = [0, 0], sizes = [8, 128], strides = [1, 1]} : vector<32x128xf32> to vector<8x128xf32>
    %281 = arith.addf %259, %280 : vector<8x128xf32>
    %282 = vector.extract_strided_slice %279 {offsets = [8, 0], sizes = [8, 128], strides = [1, 1]} : vector<32x128xf32> to vector<8x128xf32>
    %283 = arith.addf %281, %282 : vector<8x128xf32>
    %284 = vector.extract_strided_slice %279 {offsets = [16, 0], sizes = [8, 128], strides = [1, 1]} : vector<32x128xf32> to vector<8x128xf32>
    %285 = arith.addf %283, %284 : vector<8x128xf32>
    %286 = vector.extract_strided_slice %279 {offsets = [24, 0], sizes = [8, 128], strides = [1, 1]} : vector<32x128xf32> to vector<8x128xf32>
    %287 = arith.addf %285, %286 : vector<8x128xf32>
    %cst_99 = arith.constant dense<0.000000e+00> : vector<128xf32>
    %288 = vector.multi_reduction <add>, %287, %cst_99 [0] : vector<8x128xf32> to vector<128xf32>
    %289 = vector.shape_cast %288 : vector<128xf32> to vector<1x128xf32>
    %c6_i32 = arith.constant 6 : i32
    %290 = vector.broadcast %c6_i32 : i32 to vector<8x128xi32>
    %291 = arith.cmpi eq, %3, %290 : vector<8x128xi32>
    %cst_100 = arith.constant 0.000000e+00 : f32
    %292 = vector.shape_cast %289 : vector<1x128xf32> to vector<1x128xf32>
    %293 = vector.broadcast %292 : vector<1x128xf32> to vector<8x128xf32>
    %294 = vector.broadcast %cst_100 : f32 to vector<8x128xf32>
    %295 = arith.select %291, %293, %294 : vector<8x128xi1>, vector<8x128xf32>
    %296 = arith.addf %256, %295 : vector<8x128xf32>
    %297 = vector.extract_strided_slice %10 {offsets = [0, 7], sizes = [32, 1], strides = [1, 1]} : vector<32x8xf32> to vector<32x1xf32>
    %298 = vector.extract_strided_slice %15 {offsets = [0, 7], sizes = [32, 1], strides = [1, 1]} : vector<32x8xf32> to vector<32x1xf32>
    %cst_101 = arith.constant 0.000000e+00 : f32
    %299 = vector.broadcast %cst_101 : f32 to vector<8x128xf32>
    %c0_102 = arith.constant 0 : index
    %c0_103 = arith.constant 0 : index
    %300 = vector.load %arg5[%c0_102, %c0_103] : memref<32x128xf32, #tpu.memory_space<vmem>>, vector<32x128xf32>
    %c0_104 = arith.constant 0 : index
    %c0_105 = arith.constant 0 : index
    %301 = vector.load %arg6[%c0_104, %c0_105] : memref<32x128xf32, #tpu.memory_space<vmem>>, vector<32x128xf32>
    %302 = vector.broadcast %297 : vector<32x1xf32> to vector<32x128xf32>
    %303 = arith.mulf %302, %300 : vector<32x128xf32>
    %cst_106 = arith.constant 1.000000e+00 : f32
    %304 = vector.broadcast %cst_106 : f32 to vector<32x128xf32>
    %305 = arith.subf %304, %303 : vector<32x128xf32>
    %306 = vector.broadcast %298 : vector<32x1xf32> to vector<32x128xf32>
    %307 = arith.mulf %306, %301 : vector<32x128xf32>
    %cst_107 = arith.constant 1.000000e+00 : f32
    %308 = vector.broadcast %cst_107 : f32 to vector<32x128xf32>
    %309 = arith.subf %308, %307 : vector<32x128xf32>
    %cst_108 = arith.constant 0.000000e+00 : f32
    %310 = vector.broadcast %cst_108 : f32 to vector<32x128xf32>
    %311 = arith.maximumf %305, %310 : vector<32x128xf32>
    %cst_109 = arith.constant 1.000000e-10 : f32
    %312 = vector.broadcast %cst_109 : f32 to vector<32x128xf32>
    %313 = arith.addf %311, %312 : vector<32x128xf32>
    %cst_110 = arith.constant 0.000000e+00 : f32
    %314 = vector.broadcast %cst_110 : f32 to vector<32x128xf32>
    %315 = arith.maximumf %309, %314 : vector<32x128xf32>
    %cst_111 = arith.constant 1.000000e-10 : f32
    %316 = vector.broadcast %cst_111 : f32 to vector<32x128xf32>
    %317 = arith.addf %315, %316 : vector<32x128xf32>
    %318 = arith.mulf %313, %317 : vector<32x128xf32>
    %319 = math.log %318 : vector<32x128xf32>
    %320 = vector.extract_strided_slice %319 {offsets = [0, 0], sizes = [8, 128], strides = [1, 1]} : vector<32x128xf32> to vector<8x128xf32>
    %321 = arith.addf %299, %320 : vector<8x128xf32>
    %322 = vector.extract_strided_slice %319 {offsets = [8, 0], sizes = [8, 128], strides = [1, 1]} : vector<32x128xf32> to vector<8x128xf32>
    %323 = arith.addf %321, %322 : vector<8x128xf32>
    %324 = vector.extract_strided_slice %319 {offsets = [16, 0], sizes = [8, 128], strides = [1, 1]} : vector<32x128xf32> to vector<8x128xf32>
    %325 = arith.addf %323, %324 : vector<8x128xf32>
    %326 = vector.extract_strided_slice %319 {offsets = [24, 0], sizes = [8, 128], strides = [1, 1]} : vector<32x128xf32> to vector<8x128xf32>
    %327 = arith.addf %325, %326 : vector<8x128xf32>
    %cst_112 = arith.constant dense<0.000000e+00> : vector<128xf32>
    %328 = vector.multi_reduction <add>, %327, %cst_112 [0] : vector<8x128xf32> to vector<128xf32>
    %329 = vector.shape_cast %328 : vector<128xf32> to vector<1x128xf32>
    %c7_i32 = arith.constant 7 : i32
    %330 = vector.broadcast %c7_i32 : i32 to vector<8x128xi32>
    %331 = arith.cmpi eq, %3, %330 : vector<8x128xi32>
    %cst_113 = arith.constant 0.000000e+00 : f32
    %332 = vector.shape_cast %329 : vector<1x128xf32> to vector<1x128xf32>
    %333 = vector.broadcast %332 : vector<1x128xf32> to vector<8x128xf32>
    %334 = vector.broadcast %cst_113 : f32 to vector<8x128xf32>
    %335 = arith.select %331, %333, %334 : vector<8x128xi1>, vector<8x128xf32>
    %336 = arith.addf %296, %335 : vector<8x128xf32>
    %c8_i32 = arith.constant 8 : i32
    %337 = arith.muli %5, %c8_i32 : i32
    %338 = tpu.assume_multiple %337, 8 : i32
    %339 = arith.index_cast %338 : i32 to index
    %c0_114 = arith.constant 0 : index
    %340 = vector.load %arg9[%339, %c0_114] : memref<8x128xf32, #tpu.memory_space<vmem>>, vector<8x128xf32>
    %341 = arith.addf %340, %336 : vector<8x128xf32>
    %342 = arith.index_cast %338 : i32 to index
    %c0_115 = arith.constant 0 : index
    %343 = vector.load %arg9[%342, %c0_115] : memref<8x128xf32, #tpu.memory_space<vmem>>, vector<8x128xf32>
    tpu.vector_store %arg9[%342, %c0_115], %341 {strides = array<i32>} : memref<8x128xf32, #tpu.memory_space<vmem>>, vector<8x128xf32>,
    %c1_i32_116 = arith.constant 1 : i32
    %c0_i32_117 = arith.constant 0 : i32
    %344 = arith.cmpi eq, %arg2, %c0_i32_117 : i32
    %345 = arith.extui %344 : i1 to i32
    %c0_i32_118 = arith.constant 0 : i32
    %346 = arith.cmpi ne, %345, %c0_i32_118 : i32
    scf.if %346 {
      %c0_119 = arith.constant 0 : index
      %c0_120 = arith.constant 0 : index
      %347 = vector.load %arg9[%c0_119, %c0_120] : memref<8x128xf32, #tpu.memory_space<vmem>>, vector<8x128xf32>
      %cst_121 = arith.constant 1.000000e+00 : f32
      %348 = vector.broadcast %cst_121 : f32 to vector<8x128xf32>
      %349 = arith.subf %347, %348 : vector<8x128xf32>
      %350 = tpu.reciprocal %349 : vector<8x128xf32> -> vector<8x128xf32>
      %cst_122 = arith.constant 0.000000e+00 : f32
      %351 = vector.broadcast %cst_122 : f32 to vector<8x128xf32>
      %352 = arith.subf %351, %350 : vector<8x128xf32>
      %c0_123 = arith.constant 0 : index
      %c0_124 = arith.constant 0 : index
      %353 = vector.load %arg7[%c0_123, %c0_124] : memref<1x128xf32, #tpu.memory_space<vmem>>, vector<1x128xf32>
      %354 = vector.broadcast %353 : vector<1x128xf32> to vector<8x128xf32>
      %355 = arith.mulf %352, %354 : vector<8x128xf32>
      %c0_125 = arith.constant 0 : index
      %c0_126 = arith.constant 0 : index
      %356 = vector.load %arg8[%c0_125, %c0_126] : memref<8x128xf32, #tpu.memory_space<vmem>>, vector<8x128xf32>
      tpu.vector_store %arg8[%c0_125, %c0_126], %355 {strides = array<i32>} : memref<8x128xf32, #tpu.memory_space<vmem>>, vector<8x128xf32>,
    } else {
    }
    return
  }
  func.func @transform_0(%arg0: i32, %arg1: i32, %arg2: i32) -> (i32, i32, i32) {
    %c0_i32 = arith.constant 0 : i32
    %c0_i32_0 = arith.constant 0 : i32
    return %arg0, %arg2, %c0_i32 : i32, i32, i32
  }
  func.func @transform_1(%arg0: i32, %arg1: i32, %arg2: i32) -> (i32, i32, i32) {
    %c0_i32 = arith.constant 0 : i32
    %c0_i32_0 = arith.constant 0 : i32
    return %arg0, %arg2, %c0_i32 : i32, i32, i32
  }
  func.func @transform_2(%arg0: i32, %arg1: i32, %arg2: i32) -> (i32, i32) {
    %c0_i32 = arith.constant 0 : i32
    return %arg2, %arg1 : i32, i32
  }
  func.func @transform_3(%arg0: i32, %arg1: i32, %arg2: i32) -> (i32, i32) {
    %c0_i32 = arith.constant 0 : i32
    return %arg2, %arg1 : i32, i32
  }
  func.func @transform_4(%arg0: i32, %arg1: i32, %arg2: i32) -> (i32, i32) {
    %c0_i32 = arith.constant 0 : i32
    %c0_i32_0 = arith.constant 0 : i32
    return %c0_i32, %arg1 : i32, i32
  }
  func.func @transform_5(%arg0: i32, %arg1: i32, %arg2: i32) -> (i32, i32) {
    %c0_i32 = arith.constant 0 : i32
    return %arg0, %arg1 : i32, i32
  }
}

</mosaic_0001>

<bundles_post_ra>
// kernel: tpu_custom_call.1
= control target key start
LH: loop header
LB: loop body
LE: loop exit
PB: predicated region body
PF: predicated region fallthrough
CT: control target
= control target key end

     0   :  { %v950_v3 = vmov 0   ;;  %s1280_s0 = inlined_call_operand.vmem [shape: f32[1,32,8], index: 0, kind: input, shape index: {}]   ;;  %s1281_s1 = inlined_call_operand.vmem [shape: f32[1,32,8], index: 1, kind: input, shape index: {}]   ;;  %s1282_s2 = inlined_call_operand.vmem [shape: f32[32,128], index: 2, kind: input, shape index: {}]   ;;  %s1283_s3 = inlined_call_operand.vmem [shape: f32[32,128], index: 3, kind: input, shape index: {}]   ;;  %s1284_s4 = inlined_call_operand.vmem [shape: f32[1,128], index: 4, kind: input, shape index: {}]   ;;  %s1285_s5 = inlined_call_operand.hbm [shape: f32[8,128], index: 5, kind: output, shape index: {}]  }
   0x1   :  { %v36_v0 = vld [vmem:[%s1281_s1] sm:$0xff]  ;;  %v30_v1 = vld [vmem:[%s1280_s0 + $0x10] sm:$0xff]  ;;  %829 = vset.pattern.permute.xlu2 %v950_v3  ;;  %828 = vset.pattern.permute.xlu1 %v950_v3 }
   0x2   :  { %v28_v2 = vld [vmem:[%s1280_s0] sm:$0xff]  ;;  %v998_v4 = vsub.f32 1.0, %v36_v0  ;;  %v1000_v5 = vsub.f32 1.0, %v30_v1  ;;  %827 = vset.pattern.permute.xlu0 %v950_v3 }
   0x3   :  { %v1002_v6 = vsub.f32 1.0, %v28_v2 }
   0x4   :  { %82 = vperm.xlu2 %829, %v998_v4   ;;  %64 = vperm.xlu1 %828, %v1000_v5  }
   0x5   :  { %10 = vsyncpa [#allocation4], 0  ;;  %54 = vperm.xlu0 %827, %v1002_v6   ;;  %v37_v7 = vld [vmem:[%s1281_s1 + $0x8] sm:$0xff]  ;;  %v31_v8 = vld [vmem:[%s1280_s0 + $0x18] sm:$0xff]  ;;  %v951_v17 = vmov 1   ;;  %v952_v18 = vmov 2  }
   0x6   :  { %v29_v9 = vld [vmem:[%s1280_s0 + $0x8] sm:$0xff]  ;;  %v1016_v10 = vsub.f32 1.0, %v37_v7  ;;  %v1018_v11 = vsub.f32 1.0, %v31_v8  ;;  %v39_v13 = vld [vmem:[%s1281_s1 + $0x18] sm:$0xff]  ;;  %v38_v14 = vld [vmem:[%s1281_s1 + $0x10] sm:$0xff]  ;;  %v953_v19 = vmov 3  }
   0x7   :  { %v1020_v12 = vsub.f32 1.0, %v29_v9  ;;  %v1031_v15 = vsub.f32 1.0, %v39_v13  ;;  %v1033_v16 = vsub.f32 1.0, %v38_v14  ;;  %v954_v20 = vmov 4   ;;  %v1072_v24 = vld [vmem:[%s1283_s3] sm:$0xff]  ;;  %v1089_v31 = vld [vmem:[%s1283_s3 + $0x8] sm:$0xff] }
   0x8   :  { %v955_v22 = vmov 5   ;;  %v956_v27 = vmov 7   ;;  %v1084_v28 = vld [vmem:[%s1282_s2] sm:$0xff]  ;;  %v957_v38 = vmov 6   ;;  %v1103_v40 = vld [vmem:[%s1282_s2 + $0x8] sm:$0xff]  ;;  %v1108_v44 = vld [vmem:[%s1282_s2 + $0x18] sm:$0xff] }
   0x9   :  { %v1113_v46 = vld [vmem:[%s1282_s2 + $0x10] sm:$0xff]  ;;  %v1124_v56 = vld [vmem:[%s1283_s3 + $0x18] sm:$0xff]  ;;  %s958_s25 = smov [#allocation3]   ;;  %s808_s29 = sshll.u32 %s1285_s5, 4  ;;  %s809_s29 = int_to_ptr.hbm [resolvable:$true] %s808_s29 }
   0xa   :  { %v1130_v58 = vld [vmem:[%s1283_s3 + $0x10] sm:$0xff]  ;;  %s806_s26 = sshll.u32 %s958_s25, 4  ;;  %s807_s26 = int_to_ptr.vmem [resolvable:$true] %s806_s26 }
   0xc   :  { %87 = vperm.xlu2 %829, %v1016_v10   ;;  %69 = vperm.xlu1 %828, %v1018_v11  }
   0xd   :  { %59 = vperm.xlu0 %827, %v1020_v12  }
  0x14   :  { %830 = vset.pattern.permute.xlu2 %v951_v17  ;;  %97 = vperm.xlu1 %828, %v1031_v15  }
  0x15   :  { %92 = vperm.xlu0 %827, %v1033_v16   ;;  %150 = vperm.xlu2 %830, %v1002_v6  }
  0x1c   :  { %832 = vset.pattern.permute.xlu1 %v951_v17 }
  0x1d   :  { %831 = vset.pattern.permute.xlu0 %v951_v17  ;;  %158 = vperm.xlu1 %832, %v1000_v5  }
  0x1e   :  { %162 = vperm.xlu2 %830, %v1018_v11   ;;  %154 = vperm.xlu0 %831, %v1020_v12  }
  0x25   :  { %174 = vperm.xlu1 %832, %v998_v4  }
  0x26   :  { %178 = vperm.xlu2 %830, %v1016_v10   ;;  %182 = vperm.xlu0 %831, %v1033_v16  }
  0x2d   :  { %186 = vperm.xlu1 %832, %v1031_v15  }
  0x2e   :  { %833 = vset.pattern.permute.xlu2 %v952_v18  ;;  %834 = vset.pattern.permute.xlu0 %v952_v18 }
  0x2f   :  { %239 = vperm.xlu2 %833, %v1002_v6   ;;  %243 = vperm.xlu0 %834, %v1020_v12  }
  0x35   :  { %835 = vset.pattern.permute.xlu1 %v952_v18 }
  0x36   :  { %247 = vperm.xlu1 %835, %v1000_v5  }
  0x37   :  { %251 = vperm.xlu2 %833, %v1018_v11   ;;  %271 = vperm.xlu0 %834, %v1033_v16  }
  0x3e   :  { %263 = vperm.xlu1 %835, %v998_v4  }
  0x3f   :  { %267 = vperm.xlu2 %833, %v1016_v10   ;;  %837 = vset.pattern.permute.xlu0 %v953_v19 }
  0x40   :  { %332 = vperm.xlu0 %837, %v1020_v12  }
  0x46   :  { %275 = vperm.xlu1 %835, %v1031_v15  }
  0x47   :  { %836 = vset.pattern.permute.xlu2 %v953_v19 }
  0x48   :  { %328 = vperm.xlu2 %836, %v1002_v6   ;;  %360 = vperm.xlu0 %837, %v1033_v16  }
  0x4e   :  { %838 = vset.pattern.permute.xlu1 %v953_v19 }
  0x4f   :  { %336 = vperm.xlu1 %838, %v1000_v5  }
  0x50   :  { %340 = vperm.xlu2 %836, %v1018_v11   ;;  %840 = vset.pattern.permute.xlu0 %v954_v20 }
  0x51   :  { %421 = vperm.xlu0 %840, %v1020_v12  }
  0x57   :  { %352 = vperm.xlu1 %838, %v998_v4  }
  0x58   :  { %356 = vperm.xlu2 %836, %v1016_v10  }
  0x59   :  { %449 = vperm.xlu0 %840, %v1033_v16  }
  0x5e   :  { %v83_v21 = vpop.permute.xlu2 %82 }
  0x5f   :  { %364 = vperm.xlu1 %838, %v1031_v15   ;;  %v100_v26 = vmul.f32 %v83_v21, %v1072_v24 }
  0x60   :  { %839 = vset.pattern.permute.xlu2 %v954_v20 }
  0x61   :  { %417 = vperm.xlu2 %839, %v1002_v6   ;;  %843 = vset.pattern.permute.xlu0 %v955_v22  ;;  %v104_v29 = vsub.f32 1.0, %v100_v26 }
  0x62   :  { %510 = vperm.xlu0 %843, %v1020_v12  }
  0x63   :  { %v116_v35 = vmax.f32 %v104_v29, 0.0 }
  0x65   :  { %v120_v41 = vadd.f32 1e-10, %v116_v35 }
  0x66   :  { %v88_v23 = vpop.permute.xlu2 %87 }
  0x67   :  { %841 = vset.pattern.permute.xlu1 %v954_v20  ;;  %v101_v36 = vmul.f32 %v88_v23, %v1089_v31 }
  0x68   :  { %425 = vperm.xlu1 %841, %v1000_v5  }
  0x69   :  { %429 = vperm.xlu2 %839, %v1018_v11   ;;  %v105_v42 = vsub.f32 1.0, %v101_v36 }
  0x6a   :  { %538 = vperm.xlu0 %843, %v1033_v16  }
  0x6b   :  { %v117_v52 = vmax.f32 %v105_v42, 0.0 }
  0x6d   :  { %v121_v59 = vadd.f32 1e-10, %v117_v52 }
  0x6f   :  { %v1074_v25 = vpop.permute.xlu2 %150 }
  0x70   :  { %441 = vperm.xlu1 %841, %v998_v4  }
  0x71   :  { %445 = vperm.xlu2 %839, %v1016_v10  }
  0x72   :  { %849 = vset.pattern.permute.xlu0 %v956_v27 }
  0x73   :  { %684 = vperm.xlu0 %849, %v1002_v6  }
  0x76   :  { %v65_v30 = vpop.permute.xlu1 %64 }
  0x77   :  { %v55_v32 = vpop.permute.xlu0 %54  ;;  %v74_v53 = vmul.f32 %v65_v30, %v1113_v46 }
  0x78   :  { %v72_v33 = vmul.f32 %v55_v32, %v1084_v28  ;;  %453 = vperm.xlu1 %841, %v1031_v15   ;;  %v1093_v34 = vpop.permute.xlu2 %162 }
  0x79   :  { %842 = vset.pattern.permute.xlu2 %v955_v22  ;;  %v78_v60 = vsub.f32 1.0, %v74_v53 }
  0x7a   :  { %v76_v37 = vsub.f32 1.0, %v72_v33  ;;  %506 = vperm.xlu2 %842, %v1002_v6  }
  0x7b   :  { %850 = vset.pattern.permute.xlu0 %v957_v38  ;;  %v110_v9 = vmax.f32 %v78_v60, 0.0 }
  0x7c   :  { %v108_v39 = vmax.f32 %v76_v37, 0.0  ;;  %619 = vperm.xlu0 %850, %v998_v4  }
  0x7d   :  { %v114_v23 = vadd.f32 1e-10, %v110_v9 }
  0x7e   :  { %v112_v43 = vadd.f32 1e-10, %v108_v39  ;;  %v70_v45 = vpop.permute.xlu1 %69 }
  0x7f   :  { %v60_v47 = vpop.permute.xlu0 %59  ;;  %v75_v51 = vmul.f32 %v70_v45, %v1108_v44 }
  0x80   :  { %v124_v48 = vmul.f32 %v120_v41, %v112_v43  ;;  %v73_v49 = vmul.f32 %v60_v47, %v1103_v40  ;;  %844 = vset.pattern.permute.xlu1 %v955_v22  ;;  %v179_v50 = vpop.permute.xlu2 %178  ;;  %v165_v43 = vmul.f32 %v1074_v25, %v1084_v28 }
  0x81   :  { %514 = vperm.xlu1 %844, %v1000_v5   ;;  %v79_v57 = vsub.f32 1.0, %v75_v51  ;;  %v190_v14 = vmul.f32 %v179_v50, %v1089_v31 }
  0x82   :  { %v77_v54 = vsub.f32 1.0, %v73_v49  ;;  %518 = vperm.xlu2 %842, %v1018_v11   ;;  %857 = vlog2.f32 %v124_v48  ;;  %v169_v51 = vsub.f32 1.0, %v165_v43 }
  0x83   :  { %v111_v3 = vmax.f32 %v79_v57, 0.0  ;;  %v194_v29 = vsub.f32 1.0, %v190_v14 }
  0x84   :  { %v109_v55 = vmax.f32 %v77_v54, 0.0  ;;  %631 = vperm.xlu0 %850, %v1031_v15  }
  0x85   :  { %v115_v19 = vadd.f32 1e-10, %v111_v3  ;;  %v206_v47 = vmax.f32 %v194_v29, 0.0 }
  0x86   :  { %v113_v61 = vadd.f32 1e-10, %v109_v55  ;;  %v98_v62 = vpop.permute.xlu1 %97 }
  0x87   :  { %v103_v63 = vmul.f32 %v98_v62, %v1124_v56  ;;  %v93_v0 = vpop.permute.xlu0 %92  ;;  %v210_v53 = vadd.f32 1e-10, %v206_v47 }
  0x88   :  { %v125_v1 = vmul.f32 %v121_v59, %v113_v61  ;;  %v102_v2 = vmul.f32 %v93_v0, %v1130_v58  ;;  %v858_v21 = vpop.eup %857  ;;  %v197_v0 = vmax.f32 %v169_v51, 0.0 }
  0x89   :  { %v107_v7 = vsub.f32 1.0, %v103_v63  ;;  %530 = vperm.xlu1 %844, %v998_v4   ;;  %v1135_v8 = vpop.permute.xlu2 %239  ;;  %v129_v37 = vmul.f32 0.6931472, %v858_v21 }
  0x8a   :  { %859 = vlog2.f32 %v125_v1  ;;  %v106_v13 = vsub.f32 1.0, %v102_v2  ;;  %534 = vperm.xlu2 %842, %v1016_v10   ;;  %v168_v1 = vmul.f32 %v1093_v34, %v1108_v44 }
  0x8b   :  { %v119_v17 = vmax.f32 %v107_v7, 0.0 }
  0x8c   :  { %v118_v18 = vmax.f32 %v106_v13, 0.0  ;;  %855 = vset.pattern.permute.xlu0 %v956_v27  ;;  %v172_v21 = vsub.f32 1.0, %v168_v1 }
  0x8d   :  { %v123_v20 = vadd.f32 1e-10, %v119_v17 }
  0x8e   :  { %v122_v26 = vadd.f32 1e-10, %v118_v18 }
  0x8f   :  { %v127_v30 = vmul.f32 %v123_v20, %v115_v19  ;;  %v159_v32 = vpop.permute.xlu1 %158  ;;  %v201_v20 = vadd.f32 1e-10, %v197_v0 }
  0x90   :  { %v860_v33 = vpop.eup %859  ;;  %v126_v35 = vmul.f32 %v122_v26, %v114_v23  ;;  %v155_v36 = vpop.permute.xlu0 %154  ;;  %v167_v48 = vmul.f32 %v159_v32, %v1113_v46 }
  0x91   :  { %v131_v39 = vmul.f32 0.6931472, %v860_v33  ;;  %861 = vlog2.f32 %v127_v30  ;;  %v166_v41 = vmul.f32 %v155_v36, %v1103_v40  ;;  %845 = vset.pattern.permute.xlu1 %v957_v38  ;;  %v1142_v42 = vpop.permute.xlu2 %251  ;;  %v200_v36 = vmax.f32 %v172_v21, 0.0 }
  0x92   :  { %863 = vlog2.f32 %v126_v35  ;;  %846 = vset.pattern.permute.xlu2 %v957_v38  ;;  %595 = vperm.xlu1 %845, %v1002_v6   ;;  %v171_v54 = vsub.f32 1.0, %v167_v48 }
  0x93   :  { %v137_v45 = vadd.f32 %v131_v39, %v129_v37  ;;  %v170_v49 = vsub.f32 1.0, %v166_v41  ;;  %599 = vperm.xlu2 %846, %v1020_v12  }
  0x94   :  { %v199_v9 = vmax.f32 %v171_v54, 0.0 }
  0x95   :  { %v198_v50 = vmax.f32 %v170_v49, 0.0  ;;  %v204_v49 = vadd.f32 1e-10, %v200_v36 }
  0x96   :  { %v203_v34 = vadd.f32 1e-10, %v199_v9 }
  0x97   :  { %v862_v52 = vpop.eup %861  ;;  %v202_v55 = vadd.f32 1e-10, %v198_v50  ;;  %v175_v57 = vpop.permute.xlu1 %174 }
  0x98   :  { %v864_v25 = vpop.eup %863  ;;  %v189_v59 = vmul.f32 %v175_v57, %v1072_v24  ;;  %v183_v60 = vpop.permute.xlu0 %182  ;;  %v135_v3 = vmul.f32 0.6931472, %v862_v52 }
  0x99   :  { %v133_v61 = vmul.f32 0.6931472, %v864_v25  ;;  %v214_v6 = vmul.f32 %v210_v53, %v202_v55  ;;  %v191_v62 = vmul.f32 %v183_v60, %v1130_v58  ;;  %v268_v63 = vpop.permute.xlu2 %267 }
  0x9a   :  { %v193_v2 = vsub.f32 1.0, %v189_v59  ;;  %623 = vperm.xlu1 %845, %v1016_v10   ;;  %v279_v17 = vmul.f32 %v268_v63, %v1089_v31 }
  0x9b   :  { %v138_v7 = vadd.f32 %v137_v45, %v133_v61  ;;  %v195_v13 = vsub.f32 1.0, %v191_v62  ;;  %847 = vset.pattern.permute.xlu2 %v955_v22  ;;  %865 = vlog2.f32 %v214_v6 }
  0x9c   :  { %v205_v14 = vmax.f32 %v193_v2, 0.0  ;;  %542 = vperm.xlu2 %847, %v1031_v15   ;;  %v283_v32 = vsub.f32 1.0, %v279_v17  ;;  %v254_v2 = vmul.f32 %v1135_v8, %v1084_v28 }
  0x9d   :  { %v139_v18 = vadd.f32 %v138_v7, %v135_v3  ;;  %v207_v19 = vmax.f32 %v195_v13, 0.0 }
  0x9e   :  { %v209_v23 = vadd.f32 1e-10, %v205_v14  ;;  %v295_v43 = vmax.f32 %v283_v32, 0.0  ;;  %v258_v21 = vsub.f32 1.0, %v254_v2 }
  0x9f   :  { %v211_v26 = vadd.f32 1e-10, %v207_v19  ;;  %v187_v29 = vpop.permute.xlu1 %186  ;;  %v140_v53 = vrot.slane %v139_v18, 4 }
  0xa0   :  { %v213_v30 = vmul.f32 %v209_v23, %v201_v20  ;;  %v192_v33 = vmul.f32 %v187_v29, %v1124_v56  ;;  %v299_v54 = vadd.f32 1e-10, %v295_v43 }
  0xa1   :  { %v215_v35 = vmul.f32 %v211_v26, %v203_v34  ;;  %v244_v22 = vpop.permute.xlu0 %243  ;;  %v866_v48 = vpop.eup %865  ;;  %v141_v13 = vadd.f32 %v140_v53, %v139_v18  ;;  %v257_v18 = vmul.f32 %v1142_v42, %v1108_v44 }
  0xa2   :  { %867 = vlog2.f32 %v213_v30  ;;  %v196_v37 = vsub.f32 1.0, %v192_v33  ;;  %v255_v39 = vmul.f32 %v244_v22, %v1103_v40  ;;  %603 = vperm.xlu1 %845, %v1000_v5   ;;  %v1161_v41 = vpop.permute.xlu2 %328  ;;  %v220_v60 = vmul.f32 0.6931472, %v866_v48 }
  0xa3   :  { %869 = vlog2.f32 %v215_v35  ;;  %v142_v34 = vrot.slane %v141_v13, 2  ;;  %v261_v48 = vsub.f32 1.0, %v257_v18 }
  0xa4   :  { %v208_v45 = vmax.f32 %v196_v37, 0.0  ;;  %v259_v47 = vsub.f32 1.0, %v255_v39  ;;  %848 = vset.pattern.permute.xlu2 %v957_v38  ;;  %v26_v37 = vlaneseq }
  0xa5   :  { %627 = vperm.xlu2 %848, %v1033_v16   ;;  %v143_v36 = vadd.f32 %v142_v34, %v141_v13 }
  0xa6   :  { %v212_v50 = vadd.f32 1e-10, %v208_v45  ;;  %v287_v51 = vmax.f32 %v259_v47, 0.0 }
  0xa8   :  { %v868_v52 = vpop.eup %867  ;;  %v216_v55 = vmul.f32 %v212_v50, %v204_v49  ;;  %v291_v57 = vadd.f32 1e-10, %v287_v51  ;;  %v248_v25 = vpop.permute.xlu1 %247  ;;  %v144_v51 = vrot.slane %v143_v36, 1 }
  0xa9   :  { %v870_v59 = vpop.eup %869  ;;  %v218_v61 = vmul.f32 0.6931472, %v868_v52  ;;  %v256_v6 = vmul.f32 %v248_v25, %v1113_v46  ;;  %v272_v62 = vpop.permute.xlu0 %271  ;;  %v1181_v52 = vshrl.u32 %v26_v37, 7 }
  0xaa   :  { %871 = vlog2.f32 %v216_v55  ;;  %v303_v63 = vmul.f32 %v299_v54, %v291_v57  ;;  %v280_v0 = vmul.f32 %v272_v62, %v1130_v58  ;;  %851 = vset.pattern.permute.xlu1 %v956_v27  ;;  %v1168_v1 = vpop.permute.xlu2 %340  ;;  %v222_v7 = vmul.f32 0.6931472, %v870_v59 }
  0xab   :  { %v226_v3 = vadd.f32 %v220_v60, %v218_v61  ;;  %v260_v9 = vsub.f32 1.0, %v256_v6  ;;  %688 = vperm.xlu1 %851, %v1020_v12   ;;  %v286_v12 = vmax.f32 %v258_v21, 0.0  ;;  %v289_v55 = vmax.f32 %v261_v48, 0.0 }
  0xac   :  { %v284_v14 = vsub.f32 1.0, %v280_v0  ;;  %873 = vlog2.f32 %v303_v63  ;;  %v145_v59 = vadd.f32 %v144_v51, %v143_v36  ;;  %vm146_vm0 = vcmp.eq.s32.totalorder %v1181_v52, 0 }
  0xad   :  { %v227_v17 = vadd.f32 %v226_v3, %v222_v7  ;;  %852 = vset.pattern.permute.xlu2 %v956_v27  ;;  %v288_v19 = vmax.f32 %v260_v9, 0.0  ;;  %v290_v47 = vadd.f32 1e-10, %v286_v12  ;;  %vm235_vm1 = vcmp.eq.s32.totalorder %v1181_v52, 1 }
  0xae   :  { %v296_v20 = vmax.f32 %v284_v14, 0.0  ;;  %708 = vperm.xlu2 %852, %v998_v4   ;;  %v293_v2 = vadd.f32 1e-10, %v289_v55  ;;  %v147_v13 = vsel %vm146_vm0, %v145_v59, 0.0  ;;  %vm324_vm2 = vcmp.eq.s32.totalorder %v1181_v52, 2 }
  0xaf   :  { %v292_v30 = vadd.f32 1e-10, %v288_v19  ;;  %vm413_vm3 = vcmp.eq.s32.totalorder %v1181_v52, 3  ;;  %vm502_vm4 = vcmp.eq.s32.totalorder %v1181_v52, 4  ;;  %vm591_vm5 = vcmp.eq.s32.totalorder %v1181_v52, 5 }
  0xb0   :  { %v872_v23 = vpop.eup %871  ;;  %v264_v26 = vpop.permute.xlu1 %263  ;;  %v300_v32 = vadd.f32 1e-10, %v296_v20  ;;  %vm680_vm6 = vcmp.eq.s32.totalorder %v1181_v52, 6  ;;  %vm769_vm7 = vcmp.eq.s32.totalorder %v1181_v52, 7  ;;  %v856_v52 = vld [vmem:[%s1284_s4] ss:$0 sm:$0xff] }
  0xb1   :  { %v224_v29 = vmul.f32 0.6931472, %v872_v23  ;;  %v278_v8 = vmul.f32 %v264_v26, %v1072_v24 }
  0xb2   :  { %v357_v33 = vpop.permute.xlu2 %356  ;;  %v333_v4 = vpop.permute.xlu0 %332  ;;  %v304_v45 = vmul.f32 %v300_v32, %v292_v30 }
  0xb3   :  { %v228_v35 = vadd.f32 %v227_v17, %v224_v29  ;;  %v282_v22 = vsub.f32 1.0, %v278_v8  ;;  %712 = vperm.xlu1 %851, %v1016_v10   ;;  %v368_v6 = vmul.f32 %v357_v33, %v1089_v31  ;;  %v874_v63 = vpop.eup %873  ;;  %v344_v0 = vmul.f32 %v333_v4, %v1103_v40 }
  0xb4   :  { %875 = vlog2.f32 %v304_v45  ;;  %v309_v19 = vmul.f32 0.6931472, %v874_v63 }
  0xb5   :  { %v229_v39 = vrot.slane %v228_v35, 4  ;;  %v294_v43 = vmax.f32 %v282_v22, 0.0  ;;  %v372_v20 = vsub.f32 1.0, %v368_v6  ;;  %v348_v29 = vsub.f32 1.0, %v344_v0 }
  0xb6   :  { %853 = vset.pattern.permute.xlu2 %v957_v38 }
  0xb7   :  { %v230_v49 = vadd.f32 %v229_v39, %v228_v35  ;;  %v298_v50 = vadd.f32 1e-10, %v294_v43  ;;  %607 = vperm.xlu2 %853, %v1018_v11   ;;  %v384_v18 = vmax.f32 %v372_v20, 0.0  ;;  %v376_v35 = vmax.f32 %v348_v29, 0.0 }
  0xb8   :  { %v276_v42 = vpop.permute.xlu1 %275 }
  0xb9   :  { %v231_v10 = vrot.slane %v230_v49, 2  ;;  %v302_v53 = vmul.f32 %v298_v50, %v290_v47  ;;  %v281_v54 = vmul.f32 %v276_v42, %v1124_v56  ;;  %v388_v45 = vadd.f32 1e-10, %v384_v18 }
  0xba   :  { %v361_v60 = vpop.permute.xlu0 %360  ;;  %v876_v9 = vpop.eup %875  ;;  %v346_v42 = vmul.f32 %v1168_v1, %v1108_v44 }
  0xbb   :  { %v232_v57 = vadd.f32 %v231_v10, %v230_v49  ;;  %877 = vlog2.f32 %v302_v53  ;;  %v285_v38 = vsub.f32 1.0, %v281_v54  ;;  %692 = vperm.xlu1 %851, %v1000_v5   ;;  %v1185_v25 = vpop.permute.xlu2 %417  ;;  %v369_v5 = vmul.f32 %v361_v60, %v1130_v58 }
  0xbc   :  { %v311_v32 = vmul.f32 0.6931472, %v876_v9  ;;  %v350_v60 = vsub.f32 1.0, %v346_v42 }
  0xbd   :  { %v233_v61 = vrot.slane %v232_v57, 1  ;;  %v297_v62 = vmax.f32 %v285_v38, 0.0  ;;  %v373_v30 = vsub.f32 1.0, %v369_v5 }
  0xbf   :  { %v234_v3 = vadd.f32 %v233_v61, %v232_v57  ;;  %v301_v7 = vadd.f32 1e-10, %v297_v62  ;;  %854 = vset.pattern.permute.xlu2 %v956_v27  ;;  %v385_v4 = vmax.f32 %v373_v30, 0.0 }
  0xc0   :  { %716 = vperm.xlu2 %854, %v1033_v16   ;;  %v343_v16 = vmul.f32 %v1161_v41, %v1084_v28 }
  0xc1   :  { %v878_v14 = vpop.eup %877  ;;  %v236_v17 = vsel %vm235_vm1, %v234_v3, 0.0  ;;  %v305_v21 = vmul.f32 %v301_v7, %v293_v2  ;;  %v337_v23 = vpop.permute.xlu1 %336  ;;  %v389_v41 = vadd.f32 1e-10, %v385_v4  ;;  %v378_v3 = vmax.f32 %v350_v60, 0.0 }
  0xc2   :  { %v1194_v34 = vadd.f32 %v236_v17, %v147_v13  ;;  %v307_v26 = vmul.f32 0.6931472, %v878_v14  ;;  %v345_v8 = vmul.f32 %v337_v23, %v1113_v46  ;;  %v347_v37 = vsub.f32 1.0, %v343_v16 }
  0xc3   :  { %879 = vlog2.f32 %v305_v21  ;;  %696 = vperm.xlu1 %851, %v1018_v11   ;;  %v1198_v27 = vpop.permute.xlu2 %429  ;;  %v380_v11 = vadd.f32 1e-10, %v376_v35  ;;  %v422_v54 = vpop.permute.xlu0 %421  ;;  %v382_v21 = vadd.f32 1e-10, %v378_v3 }
  0xc4   :  { %v315_v33 = vadd.f32 %v309_v19, %v307_v26  ;;  %v349_v12 = vsub.f32 1.0, %v345_v8  ;;  %v375_v51 = vmax.f32 %v347_v37, 0.0  ;;  %v433_v17 = vmul.f32 %v422_v54, %v1103_v40 }
  0xc5   :  { %v392_v55 = vmul.f32 %v388_v45, %v380_v11  ;;  %v435_v60 = vmul.f32 %v1198_v27, %v1108_v44 }
  0xc6   :  { %v316_v22 = vadd.f32 %v315_v33, %v311_v32  ;;  %v377_v36 = vmax.f32 %v349_v12, 0.0  ;;  %v379_v59 = vadd.f32 1e-10, %v375_v51  ;;  %v437_v33 = vsub.f32 1.0, %v433_v17 }
  0xc7   :  { %881 = vlog2.f32 %v392_v55 }
  0xc8   :  { %720 = vperm.xlu2 %854, %v1031_v15   ;;  %v381_v49 = vadd.f32 1e-10, %v377_v36 }
  0xc9   :  { %v880_v39 = vpop.eup %879  ;;  %v353_v43 = vpop.permute.xlu1 %352 }
  0xca   :  { %v313_v47 = vmul.f32 0.6931472, %v880_v39  ;;  %v367_v48 = vmul.f32 %v353_v43, %v1072_v24  ;;  %v393_v38 = vmul.f32 %v389_v41, %v381_v49  ;;  %v432_v43 = vmul.f32 %v1185_v25, %v1084_v28 }
  0xcb   :  { %v446_v50 = vpop.permute.xlu2 %445  ;;  %v450_v9 = vpop.permute.xlu0 %449  ;;  %v465_v49 = vmax.f32 %v437_v33, 0.0 }
  0xcc   :  { %v317_v10 = vadd.f32 %v316_v22, %v313_v47  ;;  %v371_v53 = vsub.f32 1.0, %v367_v48  ;;  %883 = vlog2.f32 %v393_v38  ;;  %v457_v14 = vmul.f32 %v446_v50, %v1089_v31 }
  0xcd   :  { %v882_v20 = vpop.eup %881  ;;  %v458_v29 = vmul.f32 %v450_v9, %v1130_v58 }
  0xce   :  { %v318_v57 = vrot.slane %v317_v10, 4  ;;  %v383_v15 = vmax.f32 %v371_v53, 0.0  ;;  %v461_v32 = vsub.f32 1.0, %v457_v14  ;;  %v398_v35 = vmul.f32 0.6931472, %v882_v20 }
  0xcf   :  { %v462_v37 = vsub.f32 1.0, %v458_v29  ;;  %v469_v53 = vadd.f32 1e-10, %v465_v49 }
  0xd0   :  { %v319_v61 = vadd.f32 %v318_v57, %v317_v10  ;;  %v387_v6 = vadd.f32 1e-10, %v383_v15  ;;  %v473_v48 = vmax.f32 %v461_v32, 0.0 }
  0xd1   :  { %v365_v62 = vpop.permute.xlu1 %364  ;;  %v474_v51 = vmax.f32 %v462_v37, 0.0 }
  0xd2   :  { %v320_v63 = vrot.slane %v319_v61, 2  ;;  %v391_v0 = vmul.f32 %v387_v6, %v379_v59  ;;  %v370_v2 = vmul.f32 %v365_v62, %v1124_v56  ;;  %v884_v8 = vpop.eup %883  ;;  %v477_v10 = vadd.f32 1e-10, %v473_v48 }
  0xd3   :  { %v400_v45 = vmul.f32 0.6931472, %v884_v8  ;;  %v478_v38 = vadd.f32 1e-10, %v474_v51 }
  0xd4   :  { %v321_v1 = vadd.f32 %v320_v63, %v319_v61  ;;  %885 = vlog2.f32 %v391_v0  ;;  %v374_v7 = vsub.f32 1.0, %v370_v2  ;;  %v1207_v5 = vpop.permute.xlu2 %506  ;;  %v481_v62 = vmul.f32 %v477_v10, %v469_v53  ;;  %v511_v63 = vpop.permute.xlu0 %510 }
  0xd6   :  { %v322_v13 = vrot.slane %v321_v1, 1  ;;  %v386_v19 = vmax.f32 %v374_v7, 0.0  ;;  %v439_v7 = vsub.f32 1.0, %v435_v60 }
  0xd8   :  { %v323_v23 = vadd.f32 %v322_v13, %v321_v1  ;;  %v390_v26 = vadd.f32 1e-10, %v386_v19 }
  0xda   :  { %v886_v30 = vpop.eup %885  ;;  %v325_v16 = vsel %vm324_vm2, %v323_v23, 0.0  ;;  %v394_v12 = vmul.f32 %v390_v26, %v382_v21  ;;  %v426_v18 = vpop.permute.xlu1 %425  ;;  %v467_v21 = vmax.f32 %v439_v7, 0.0 }
  0xdb   :  { %v1214_v22 = vadd.f32 %v325_v16, %v1194_v34  ;;  %v396_v36 = vmul.f32 0.6931472, %v886_v30  ;;  %v434_v4 = vmul.f32 %v426_v18, %v1113_v46  ;;  %v436_v34 = vsub.f32 1.0, %v432_v43 }
  0xdc   :  { %887 = vlog2.f32 %v394_v12  ;;  %v1217_v39 = vpop.permute.xlu2 %518  ;;  %v539_v29 = vpop.permute.xlu0 %538  ;;  %v522_v30 = vmul.f32 %v511_v63, %v1103_v40  ;;  %v471_v12 = vadd.f32 1e-10, %v467_v21 }
  0xdd   :  { %v404_v11 = vadd.f32 %v398_v35, %v396_v36  ;;  %v438_v47 = vsub.f32 1.0, %v434_v4  ;;  %v464_v25 = vmax.f32 %v436_v34, 0.0  ;;  %889 = vlog2.f32 %v481_v62 }
  0xde   :  { %v547_v36 = vmul.f32 %v539_v29, %v1130_v58  ;;  %v521_v34 = vmul.f32 %v1207_v5, %v1084_v28  ;;  %v524_v53 = vmul.f32 %v1217_v39, %v1108_v44 }
  0xdf   :  { %v405_v41 = vadd.f32 %v404_v11, %v400_v45  ;;  %v466_v50 = vmax.f32 %v438_v47, 0.0  ;;  %v468_v1 = vadd.f32 1e-10, %v464_v25  ;;  %v526_v11 = vsub.f32 1.0, %v522_v30 }
  0xe0   :  { %v528_v62 = vsub.f32 1.0, %v524_v53 }
  0xe1   :  { %v470_v15 = vadd.f32 1e-10, %v466_v50 }
  0xe2   :  { %v888_v42 = vpop.eup %887  ;;  %v442_v54 = vpop.permute.xlu1 %441 }
  0xe3   :  { %v402_v55 = vmul.f32 0.6931472, %v888_v42  ;;  %v456_v57 = vmul.f32 %v442_v54, %v1072_v24  ;;  %v482_v3 = vmul.f32 %v478_v38, %v470_v15  ;;  %v890_v32 = vpop.eup %889  ;;  %v551_v42 = vsub.f32 1.0, %v547_v36 }
  0xe4   :  { %v535_v59 = vpop.permute.xlu2 %534  ;;  %v487_v43 = vmul.f32 0.6931472, %v890_v32  ;;  %v554_v15 = vmax.f32 %v526_v11, 0.0 }
  0xe5   :  { %v406_v61 = vadd.f32 %v405_v41, %v402_v55  ;;  %v460_v6 = vsub.f32 1.0, %v456_v57  ;;  %891 = vlog2.f32 %v482_v3  ;;  %v546_v33 = vmul.f32 %v535_v59, %v1089_v31 }
  0xe6   :  { %v563_v60 = vmax.f32 %v551_v42, 0.0  ;;  %v558_v63 = vadd.f32 1e-10, %v554_v15 }
  0xe7   :  { %v407_v0 = vrot.slane %v406_v61, 4  ;;  %v472_v2 = vmax.f32 %v460_v6, 0.0  ;;  %v550_v50 = vsub.f32 1.0, %v546_v33  ;;  %v525_v6 = vsub.f32 1.0, %v521_v34 }
  0xe9   :  { %v408_v9 = vadd.f32 %v407_v0, %v406_v61  ;;  %v476_v13 = vadd.f32 1e-10, %v472_v2  ;;  %v562_v38 = vmax.f32 %v550_v50, 0.0 }
  0xea   :  { %v454_v14 = vpop.permute.xlu1 %453 }
  0xeb   :  { %v409_v17 = vrot.slane %v408_v9, 2  ;;  %v480_v19 = vmul.f32 %v476_v13, %v468_v1  ;;  %v459_v20 = vmul.f32 %v454_v14, %v1124_v56  ;;  %v892_v4 = vpop.eup %891  ;;  %v566_v2 = vadd.f32 1e-10, %v562_v38 }
  0xec   :  { %v489_v10 = vmul.f32 0.6931472, %v892_v4  ;;  %v553_v13 = vmax.f32 %v525_v6, 0.0  ;;  %v556_v14 = vmax.f32 %v528_v62, 0.0 }
  0xed   :  { %v410_v27 = vadd.f32 %v409_v17, %v408_v9  ;;  %893 = vlog2.f32 %v480_v19  ;;  %v463_v23 = vsub.f32 1.0, %v459_v20  ;;  %v1225_v26 = vpop.permute.xlu2 %599  ;;  %v567_v9 = vadd.f32 1e-10, %v563_v60  ;;  %v1241_v20 = vpop.permute.xlu0 %684 }
  0xee   :  { %v560_v32 = vadd.f32 1e-10, %v556_v14 }
  0xef   :  { %v411_v8 = vrot.slane %v410_v27, 1  ;;  %v475_v16 = vmax.f32 %v463_v23, 0.0 }
  0xf1   :  { %v412_v18 = vadd.f32 %v411_v8, %v410_v27  ;;  %v479_v35 = vadd.f32 1e-10, %v475_v16  ;;  %v570_v27 = vmul.f32 %v566_v2, %v558_v63  ;;  %v557_v16 = vadd.f32 1e-10, %v553_v13 }
  0xf3   :  { %v894_v37 = vpop.eup %893  ;;  %v414_v45 = vsel %vm413_vm3, %v412_v18, 0.0  ;;  %v483_v47 = vmul.f32 %v479_v35, %v471_v12  ;;  %v515_v48 = vpop.permute.xlu1 %514 }
  0xf4   :  { %v1232_v49 = vadd.f32 %v414_v45, %v1214_v22  ;;  %v485_v41 = vmul.f32 0.6931472, %v894_v37  ;;  %v523_v51 = vmul.f32 %v515_v48, %v1113_v46 }
  0xf5   :  { %895 = vlog2.f32 %v483_v47  ;;  %v620_v11 = vpop.permute.xlu0 %619 }
  0xf6   :  { %v493_v54 = vadd.f32 %v487_v43, %v485_v41  ;;  %v527_v55 = vsub.f32 1.0, %v523_v51  ;;  %v543_v57 = vpop.permute.xlu2 %542  ;;  %897 = vlog2.f32 %v570_v27  ;;  %v634_v15 = vmul.f32 %v620_v11, %v1072_v24 }
  0xf7   :  { %v548_v22 = vmul.f32 %v543_v57, %v1124_v56 }
  0xf8   :  { %v494_v59 = vadd.f32 %v493_v54, %v489_v10  ;;  %v555_v25 = vmax.f32 %v527_v55, 0.0 }
  0xf9   :  { %v552_v61 = vsub.f32 1.0, %v548_v22 }
  0xfa   :  { %v559_v7 = vadd.f32 1e-10, %v555_v25 }
  0xfb   :  { %v896_v5 = vpop.eup %895  ;;  %v531_v0 = vpop.permute.xlu1 %530  ;;  %v564_v1 = vmax.f32 %v552_v61, 0.0  ;;  %v611_v61 = vmul.f32 %v1225_v26, %v1103_v40 }
  0xfc   :  { %v491_v3 = vmul.f32 0.6931472, %v896_v5  ;;  %v545_v39 = vmul.f32 %v531_v0, %v1072_v24  ;;  %v571_v30 = vmul.f32 %v567_v9, %v559_v7  ;;  %v898_v47 = vpop.eup %897  ;;  %v638_v5 = vsub.f32 1.0, %v634_v15 }
  0xfd   :  { %v568_v29 = vadd.f32 1e-10, %v564_v1  ;;  %v576_v42 = vmul.f32 0.6931472, %v898_v47  ;;  %v632_v60 = vpop.permute.xlu0 %631  ;;  %v615_v9 = vsub.f32 1.0, %v611_v61 }
  0xfe   :  { %v495_v17 = vadd.f32 %v494_v59, %v491_v3  ;;  %v549_v19 = vsub.f32 1.0, %v545_v39  ;;  %899 = vlog2.f32 %v571_v30  ;;  %v637_v2 = vmul.f32 %v632_v60, %v1124_v56 }
  0xff   :  { %v628_v21 = vpop.permute.xlu2 %627  ;;  %v572_v35 = vmul.f32 %v568_v29, %v560_v32 }
 0x100   :  { %v496_v23 = vrot.slane %v495_v17, 4  ;;  %v561_v8 = vmax.f32 %v549_v19, 0.0 }
 0x102   :  { %v497_v33 = vadd.f32 %v496_v23, %v495_v17  ;;  %v565_v12 = vadd.f32 1e-10, %v561_v8  ;;  %v650_v17 = vmax.f32 %v638_v5, 0.0  ;;  %v643_v8 = vmax.f32 %v615_v9, 0.0 }
 0x104   :  { %v498_v18 = vrot.slane %v497_v33, 2  ;;  %v569_v36 = vmul.f32 %v565_v12, %v557_v16  ;;  %v596_v4 = vpop.permute.xlu1 %595  ;;  %v900_v41 = vpop.eup %899  ;;  %v654_v32 = vadd.f32 1e-10, %v650_v17 }
 0x105   :  { %v578_v55 = vmul.f32 0.6931472, %v900_v41  ;;  %v610_v25 = vmul.f32 %v596_v4, %v1084_v28 }
 0x106   :  { %v499_v37 = vadd.f32 %v498_v18, %v497_v33  ;;  %901 = vlog2.f32 %v569_v36 }
 0x107   :  { %903 = vlog2.f32 %v572_v35  ;;  %v614_v1 = vsub.f32 1.0, %v610_v25 }
 0x108   :  { %v500_v43 = vrot.slane %v499_v37, 1  ;;  %v1243_v45 = vpop.permute.xlu2 %708 }
 0x109   :  { %v642_v23 = vmax.f32 %v614_v1, 0.0 }
 0x10a   :  { %v501_v48 = vadd.f32 %v500_v43, %v499_v37  ;;  %v647_v37 = vadd.f32 1e-10, %v643_v8 }
 0x10b   :  { %v646_v35 = vadd.f32 1e-10, %v642_v23 }
 0x10c   :  { %v902_v50 = vpop.eup %901  ;;  %v503_v51 = vsel %vm502_vm4, %v501_v48, 0.0  ;;  %v624_v34 = vpop.permute.xlu1 %623 }
 0x10d   :  { %v504_v10 = vadd.f32 %v503_v51, %v1232_v49  ;;  %v574_v53 = vmul.f32 0.6931472, %v902_v50  ;;  %v904_v54 = vpop.eup %903  ;;  %v635_v22 = vmul.f32 %v624_v34, %v1089_v31  ;;  %v636_v49 = vmul.f32 %v628_v21, %v1130_v58 }
 0x10e   :  { %v580_v38 = vmul.f32 0.6931472, %v904_v54  ;;  %v641_v21 = vsub.f32 1.0, %v637_v2  ;;  %v658_v41 = vmul.f32 %v654_v32, %v646_v35 }
 0x10f   :  { %v582_v57 = vadd.f32 %v576_v42, %v574_v53  ;;  %v639_v63 = vsub.f32 1.0, %v635_v22  ;;  %v640_v26 = vsub.f32 1.0, %v636_v49 }
 0x111   :  { %v583_v59 = vadd.f32 %v582_v57, %v578_v55  ;;  %v608_v6 = vpop.permute.xlu2 %607  ;;  %v651_v19 = vmax.f32 %v639_v63, 0.0  ;;  %v652_v33 = vmax.f32 %v640_v26, 0.0  ;;  %v699_v55 = vmul.f32 %v1241_v20, %v1084_v28 }
 0x112   :  { %v613_v7 = vmul.f32 %v608_v6, %v1108_v44  ;;  %v653_v44 = vmax.f32 %v641_v21, 0.0  ;;  %v723_v57 = vmul.f32 %v1243_v45, %v1072_v24 }
 0x113   :  { %v584_v62 = vadd.f32 %v583_v59, %v580_v38  ;;  %v655_v12 = vadd.f32 1e-10, %v651_v19  ;;  %v656_v47 = vadd.f32 1e-10, %v652_v33  ;;  %v703_v60 = vsub.f32 1.0, %v699_v55 }
 0x114   :  { %v604_v0 = vpop.permute.xlu1 %603  ;;  %v617_v29 = vsub.f32 1.0, %v613_v7  ;;  %v657_v34 = vadd.f32 1e-10, %v653_v44  ;;  %v727_v61 = vsub.f32 1.0, %v723_v57 }
 0x115   :  { %v585_v3 = vrot.slane %v584_v62, 4  ;;  %v612_v39 = vmul.f32 %v604_v0, %v1113_v46  ;;  %v659_v48 = vmul.f32 %v655_v12, %v647_v37  ;;  %v731_v24 = vmax.f32 %v703_v60, 0.0  ;;  %v923_v12 = vld [vmem:[%s1282_s2 + $0x18] sm:$0xff] }
 0x116   :  { %v645_v36 = vmax.f32 %v617_v29, 0.0  ;;  %v739_v63 = vmax.f32 %v727_v61, 0.0 }
 0x117   :  { %v586_v13 = vadd.f32 %v585_v3, %v584_v62  ;;  %v616_v14 = vsub.f32 1.0, %v612_v39  ;;  %905 = vlog2.f32 %v659_v48 }
 0x118   :  { %v649_v50 = vadd.f32 1e-10, %v645_v36  ;;  %907 = vlog2.f32 %v658_v41  ;;  %v743_v26 = vadd.f32 1e-10, %v739_v63 }
 0x119   :  { %v587_v27 = vrot.slane %v586_v13, 2  ;;  %v644_v30 = vmax.f32 %v616_v14, 0.0  ;;  %v735_v14 = vadd.f32 1e-10, %v731_v24 }
 0x11a   :  { %v717_v54 = vpop.permute.xlu2 %716  ;;  %v661_v15 = vmul.f32 %v657_v34, %v649_v50 }
 0x11b   :  { %v588_v16 = vadd.f32 %v587_v27, %v586_v13  ;;  %v648_v43 = vadd.f32 1e-10, %v644_v30  ;;  %v725_v25 = vmul.f32 %v717_v54, %v1130_v58  ;;  %v747_v32 = vmul.f32 %v743_v26, %v735_v14 }
 0x11d   :  { %v589_v18 = vrot.slane %v588_v16, 1  ;;  %v689_v4 = vpop.permute.xlu1 %688  ;;  %v660_v42 = vmul.f32 %v656_v47, %v648_v43  ;;  %v906_v6 = vpop.eup %905  ;;  %v729_v28 = vsub.f32 1.0, %v725_v25 }
 0x11e   :  { %v700_v38 = vmul.f32 %v689_v4, %v1103_v40  ;;  %v908_v20 = vpop.eup %907  ;;  %v665_v45 = vmul.f32 0.6931472, %v906_v6 }
 0x11f   :  { %v590_v11 = vadd.f32 %v589_v18, %v588_v16  ;;  %909 = vlog2.f32 %v660_v42  ;;  %v741_v3 = vmax.f32 %v729_v28, 0.0  ;;  %v663_v58 = vmul.f32 0.6931472, %v908_v20 }
 0x120   :  { %911 = vlog2.f32 %v661_v15  ;;  %v704_v62 = vsub.f32 1.0, %v700_v38 }
 0x121   :  { %v592_v51 = vsel %vm591_vm5, %v590_v11, 0.0  ;;  %v671_v17 = vadd.f32 %v665_v45, %v663_v58  ;;  %v745_v27 = vadd.f32 1e-10, %v741_v3 }
 0x122   :  { %v1257_v53 = vadd.f32 %v592_v51, %v504_v10  ;;  %v721_v2 = vpop.permute.xlu2 %720  ;;  %v732_v40 = vmax.f32 %v704_v62, 0.0 }
 0x123   :  { %v726_v13 = vmul.f32 %v721_v2, %v1124_v56 }
 0x124   :  { %v736_v19 = vadd.f32 1e-10, %v732_v40 }
 0x125   :  { %v713_v22 = vpop.permute.xlu1 %712  ;;  %v910_v5 = vpop.eup %909  ;;  %v730_v16 = vsub.f32 1.0, %v726_v13 }
 0x126   :  { %v724_v59 = vmul.f32 %v713_v22, %v1089_v31  ;;  %v667_v1 = vmul.f32 0.6931472, %v910_v5  ;;  %v912_v39 = vpop.eup %911 }
 0x127   :  { %v669_v21 = vmul.f32 0.6931472, %v912_v39  ;;  %v742_v35 = vmax.f32 %v730_v16, 0.0 }
 0x128   :  { %v728_v10 = vsub.f32 1.0, %v724_v59  ;;  %v672_v29 = vadd.f32 %v671_v17, %v667_v1 }
 0x129   :  { %v746_v37 = vadd.f32 1e-10, %v742_v35 }
 0x12a   :  { %v740_v49 = vmax.f32 %v728_v10, 0.0  ;;  %v673_v56 = vadd.f32 %v672_v29, %v669_v21 }
 0x12c   :  { %v744_v7 = vadd.f32 1e-10, %v740_v49  ;;  %v674_v4 = vrot.slane %v673_v56, 4 }
 0x12d   :  { %v693_v0 = vpop.permute.xlu1 %692 }
 0x12e   :  { %v701_v31 = vmul.f32 %v693_v0, %v1113_v46  ;;  %v748_v8 = vmul.f32 %v744_v7, %v736_v19  ;;  %v675_v41 = vadd.f32 %v674_v4, %v673_v56 }
 0x130   :  { %v705_v9 = vsub.f32 1.0, %v701_v31  ;;  %913 = vlog2.f32 %v748_v8  ;;  %v676_v42 = vrot.slane %v675_v41, 2 }
 0x131   :  { %915 = vlog2.f32 %v747_v32 }
 0x132   :  { %v733_v23 = vmax.f32 %v705_v9, 0.0  ;;  %v677_v15 = vadd.f32 %v676_v42, %v675_v41 }
 0x134   :  { %v737_v30 = vadd.f32 1e-10, %v733_v23  ;;  %v678_v25 = vrot.slane %v677_v15, 1 }
 0x135   :  { %v697_v46 = vpop.permute.xlu1 %696 }
 0x136   :  { %v749_v33 = vmul.f32 %v745_v27, %v737_v30  ;;  %v702_v18 = vmul.f32 %v923_v12, %v697_v46  ;;  %v914_v11 = vpop.eup %913  ;;  %v679_v61 = vadd.f32 %v678_v25, %v677_v15 }
 0x137   :  { %v916_v48 = vpop.eup %915  ;;  %v754_v51 = vmul.f32 0.6931472, %v914_v11 }
 0x138   :  { %v706_v36 = vsub.f32 1.0, %v702_v18  ;;  %917 = vlog2.f32 %v749_v33  ;;  %v752_v34 = vmul.f32 0.6931472, %v916_v48  ;;  %v681_v28 = vsel %vm680_vm6, %v679_v61, 0.0 }
 0x139   :  { %v682_v49 = vadd.f32 %v681_v28, %v1257_v53 }
 0x13a   :  { %v734_v44 = vmax.f32 %v706_v36, 0.0  ;;  %v760_v55 = vadd.f32 %v754_v51, %v752_v34 }
 0x13c   :  { %v738_v43 = vadd.f32 1e-10, %v734_v44 }
 0x13e   :  { %v750_v47 = vmul.f32 %v746_v37, %v738_v43  ;;  %v918_v50 = vpop.eup %917 }
 0x13f   :  { %v756_v54 = vmul.f32 0.6931472, %v918_v50 }
 0x140   :  { %919 = vlog2.f32 %v750_v47 }
 0x141   :  { %v761_v22 = vadd.f32 %v760_v55, %v756_v54 }
 0x146   :  { %v920_v57 = vpop.eup %919 }
 0x147   :  { %v758_v38 = vmul.f32 0.6931472, %v920_v57 }
 0x149   :  { %v762_v59 = vadd.f32 %v761_v22, %v758_v38 }
 0x14b   :  { %v763_v10 = vrot.slane %v762_v59, 4 }
 0x14d   :  { %v764_v60 = vadd.f32 %v763_v10, %v762_v59 }
 0x14f   :  { %v765_v6 = vrot.slane %v764_v60, 2 }
 0x151   :  { %v766_v62 = vadd.f32 %v765_v6, %v764_v60 }
 0x153   :  { %v767_v20 = vrot.slane %v766_v62, 1 }
 0x155   :  { %v768_v5 = vadd.f32 %v767_v20, %v766_v62 }
 0x157   :  { %v770_v24 = vsel %vm769_vm7, %v768_v5, 0.0 }
 0x158   :  { %v771_v45 = vadd.f32 %v770_v24, %v682_v49 }
 0x15a   :  { %v817_v63 = vadd.f32 -1.0, %v771_v45 }
 0x15c   :  { %921 = vrcp.f32 %v817_v63  ;;  %v791_v3 = vand.u32 2147483648, %v817_v63  ;;  %v789_v58 = vand.u32 2147483647, %v817_v63  ;;  %vm785_vm9 = vweird.f32 %v817_v63 }
 0x15e   :  { %v792_v39 = vor.u32 1.1754944e-38, %v791_v3  ;;  %vm790_vm11 = vcmp.eq.f32.partialorder %v789_v58, 8.507059e+37 }
 0x162   :  { %v922_v0 = vpop.eup %921 }
 0x163   :  { %v781_v2 = vmul.f32 %v922_v0, %v817_v63  ;;  %vm786_vm8 = vweird.f32 %v922_v0 }
 0x164   :  { %vm787_vm10 = vmor %vm785_vm9, %vm786_vm8 }
 0x165   :  { %v782_v40 = vsub.f32 1.0, %v781_v2 }
 0x167   :  { %v783_v31 = vmul.f32 %v922_v0, %v782_v40 }
 0x169   :  { %v784_v1 = vadd.f32 %v922_v0, %v783_v31 }
 0x16b   :  { %v788_v7 = vsel %vm787_vm10, %v922_v0, %v784_v1 }
 0x16c   :  { %v793_v53 = vsel %vm790_vm11, %v792_v39, %v788_v7 }
 0x16d   :  { %v794_v9 = vsub.f32 0.0, %v793_v53 }
 0x16f   :  { %v799_v13 = vmul.f32 %v856_v52, %v794_v9 }
 0x171   :  { %800 = vst [vmem:[#allocation3] sm:$0xff] %v799_v13 }
 0x172   :  { %811 = dma.vmem_to_hbm [thread:$0]  %s807_s26, 128, %s809_s29, [#allocation4]  }
 0x173   :  { %948 = dma.done.wait [#allocation4], 128  }
 0x174   :  { %949 = vsyncadd [#allocation4], 4294967168 }
 0x175   :  { %816 = vsyncpa [#allocation4], 1 }

</bundles_post_ra>
